<compile_context>
chip_gen: v6e
topology: v6e:2x2x1
jax: 0.10.0
libtpu: 0.0.40
codegen_flags: <defaults>
</compile_context>

<pallas_src>
import jax
import jax.numpy as jnp
from jax import lax
from jax.experimental import pallas as pl
from jax.experimental.pallas import tpu as pltpu


def _round_up(n, m):
    return (n + m - 1) // m * m


def vae_kernel(x_ref, eps_ref, w1_ref, b1_ref, wh_ref, bh_ref,
               wd1_ref, bd1_ref, wd2_ref, bd2_ref,
               xrec_ref, mlv_ref):
    f32 = jnp.float32
    bf16 = jnp.bfloat16

    # Encoder hidden: x read as f32 from HBM, cast to bf16 in VMEM for the MXU.
    x = x_ref[...].astype(bf16)                                   # (TM, 784)
    h = jnp.dot(x, w1_ref[...], preferred_element_type=f32)       # (TM, 400) f32 acc
    h = jnp.maximum(h + b1_ref[...], 0.0)

    # Fused heads: one dot -> lane-dense (TM, 128) slab = [mu_pad | logvar_pad].
    slab = jnp.dot(h.astype(bf16), wh_ref[...], preferred_element_type=f32) + bh_ref[...]
    mlv_ref[...] = slab

    # Reparameterize. Half-lane rotation (XLU, free slot) aligns logvar under mu.
    # Mask the rotated slab BEFORE exp so lanes >= zp become exp(0)=1 (never inf),
    # and lanes >= z_dim are annihilated by eps==0 there / zero rows of wd1.
    zp = slab.shape[1] // 2
    lane = lax.broadcasted_iota(jnp.int32, slab.shape, 1)
    rolled = pltpu.roll(slab, zp, axis=1)
    std_aligned = jnp.exp(0.5 * jnp.where(lane < zp, rolled, 0.0))
    z = slab + eps_ref[...] * std_aligned                         # (TM, 128)

    # Decoder.
    h2 = jnp.dot(z.astype(bf16), wd1_ref[...], preferred_element_type=f32)  # (TM, 400)
    h2 = jnp.maximum(h2 + bd1_ref[...], 0.0)
    logits = jnp.dot(h2.astype(bf16), wd2_ref[...], preferred_element_type=f32) + bd2_ref[...]

    # sigmoid(x) = 0.5*(1 + tanh(0.5*x)) -> a single EUP transcendental per element.
    xrec_ref[...] = (0.5 + 0.5 * jnp.tanh(0.5 * logits)).astype(xrec_ref.dtype)


def init_params(key, input_dim=784, hidden_dim=400, z_dim=20):
    """PyTorch-Linear-style init. Weights stored pre-transposed: (in_features, out_features)."""
    ks = jax.random.split(key, 10)

    def lin(kw, kb, fan_in, fan_out):
        bound = 1.0 / jnp.sqrt(fan_in)
        w = jax.random.uniform(kw, (fan_in, fan_out), jnp.float32, -bound, bound)
        b = jax.random.uniform(kb, (1, fan_out), jnp.float32, -bound, bound)
        return w, b

    w1, b1 = lin(ks[0], ks[1], input_dim, hidden_dim)
    wmu, bmu = lin(ks[2], ks[3], hidden_dim, z_dim)
    wlv, blv = lin(ks[4], ks[5], hidden_dim, z_dim)
    wd1, bd1 = lin(ks[6], ks[7], z_dim, hidden_dim)
    wd2, bd2 = lin(ks[8], ks[9], hidden_dim, input_dim)
    return {"w1": w1, "b1": b1, "wmu": wmu, "bmu": bmu, "wlv": wlv, "blv": blv,
            "wd1": wd1, "bd1": bd1, "wd2": wd2, "bd2": bd2}


def prep_params(p):
    """Fuse the two head weights into one (hidden, 2*z_p) matrix with z padded to 64
    (so the slab is exactly one 128-lane vreg wide) and cast matmul weights to bf16.
    Input/hidden dims are kept at their TRUE sizes (784/400) - Mosaic masks the tail
    tiles, so there is no MXU / DMA padding waste. Zero padding of the latent columns
    and of the decoder's extra rows keeps the padded-lane arithmetic exact."""
    z = p["wmu"].shape[1]
    z_p = _round_up(z, 64)            # 2*z_p = 128 lanes

    def padc(a, cols):                # zero-pad columns only
        return jnp.pad(a, ((0, 0), (0, cols - a.shape[1])))

    w1 = p["w1"].astype(jnp.bfloat16)                                    # (784, 400)
    b1 = p["b1"]                                                         # (1, 400)
    wh = jnp.concatenate([padc(p["wmu"], z_p), padc(p["wlv"], z_p)],
                         axis=1).astype(jnp.bfloat16)                    # (400, 128)
    bh = jnp.concatenate([padc(p["bmu"], z_p), padc(p["blv"], z_p)], axis=1)  # (1, 128)
    wd1 = jnp.pad(p["wd1"], ((0, 2 * z_p - z), (0, 0))).astype(jnp.bfloat16)  # (128, 400), rows>=z zero
    bd1 = p["bd1"]                                                       # (1, 400)
    wd2 = p["wd2"].astype(jnp.bfloat16)                                  # (400, 784)
    bd2 = p["bd2"]                                                       # (1, 784)

    return {"w1": w1, "b1": b1, "wh": wh, "bh": bh,
            "wd1": wd1, "bd1": bd1, "wd2": wd2, "bd2": bd2}


def vae_forward(x, kp, eps):
    """x: (B, input_dim) f32, eps: (B, z_dim) f32, kp: prepped params.
    Returns (x_recon[bf16], mu[f32], logvar[f32]) matching VAE.forward semantics."""
    B, d_in = x.shape
    z = eps.shape[1]
    z2 = kp["wh"].shape[1]
    z_p = z2 // 2

    # Tile selection: tiny batches run in one step; anything bigger gets >= 2 grid
    # steps (feeds both v7x TensorCores via "parallel"), capped at 256 rows so the
    # per-step footprint (~6-7 MiB) stays inside v5e's 16 MiB default scoped VMEM.
    if B <= 16:
        TM = _round_up(max(B, 8), 8)
    else:
        TM = min(256, _round_up(pl.cdiv(B, 2), 16))
    grid = (pl.cdiv(B, TM),)          # ragged final tile handled by Pallas masking

    # Only the tiny eps tensor gets a wrapper pad (20 -> 128 lanes, zeros beyond z):
    # the zeros are required for exactness of the slab reparameterization.
    ep = jnp.pad(eps, ((0, 0), (0, z2 - z)))

    def resident(a):                  # weights/biases: constant index -> VMEM-resident
        return pl.BlockSpec(a.shape, lambda i: (0,) * a.ndim)

    x_rec, mlv = pl.pallas_call(
        vae_kernel,
        out_shape=(
            jax.ShapeDtypeStruct((B, d_in), jnp.bfloat16),   # bf16 writeback: half the bytes
            jax.ShapeDtypeStruct((B, z2), jnp.float32),      # [mu | logvar] slab
        ),
        grid=grid,
        in_specs=[
            pl.BlockSpec((TM, d_in), lambda i: (i, 0)),      # x streams, unpadded f32
            pl.BlockSpec((TM, z2), lambda i: (i, 0)),        # eps streams
            resident(kp["w1"]), resident(kp["b1"]),
            resident(kp["wh"]), resident(kp["bh"]),
            resident(kp["wd1"]), resident(kp["bd1"]),
            resident(kp["wd2"]), resident(kp["bd2"]),
        ],
        out_specs=(
            pl.BlockSpec((TM, d_in), lambda i: (i, 0)),
            pl.BlockSpec((TM, z2), lambda i: (i, 0)),
        ),
        compiler_params=pltpu.CompilerParams(
            dimension_semantics=("parallel",),
        ),
    )(x, ep, kp["w1"], kp["b1"], kp["wh"], kp["bh"],
      kp["wd1"], kp["bd1"], kp["wd2"], kp["bd2"])

    # The slab is small (128 f32 lanes/row); slicing it here is negligible vs x/x_rec.
    mu = mlv[:, :z]
    logvar = mlv[:, z_p:z_p + z]
    return x_rec, mu, logvar


def vae_reference(x, p, eps):
    h = jnp.maximum(x @ p["w1"] + p["b1"], 0.0)
    mu = h @ p["wmu"] + p["bmu"]
    logvar = h @ p["wlv"] + p["blv"]
    z = mu + eps * jnp.exp(0.5 * logvar)
    h2 = jnp.maximum(z @ p["wd1"] + p["bd1"], 0.0)
    x_recon = jax.nn.sigmoid(h2 @ p["wd2"] + p["bd2"])
    return x_recon, mu, logvar


if __name__ == "__main__":
    key = jax.random.PRNGKey(0)
    k_params, k_x, k_eps = jax.random.split(key, 3)

    B, INPUT_DIM, HIDDEN_DIM, Z_DIM = 8, 784, 400, 20
    params = init_params(k_params, INPUT_DIM, HIDDEN_DIM, Z_DIM)
    kparams = prep_params(params)

    x = jax.random.normal(k_x, (B, INPUT_DIM), jnp.float32)
    eps = jax.random.normal(k_eps, (B, Z_DIM), jnp.float32)

    x_recon, mu, logvar = vae_forward(x, kparams, eps)
    jax.block_until_ready((x_recon, mu, logvar))

    xr_ref, mu_ref, lv_ref = vae_reference(x, params, eps)

    assert x_recon.shape == (B, INPUT_DIM)
    assert mu.shape == (B, Z_DIM) and logvar.shape == (B, Z_DIM)
    # bf16 matmul operands (f32 accumulation) + bf16 x_recon store -> loosened tolerance.
    assert jnp.allclose(mu, mu_ref, atol=2e-2, rtol=0), "mu mismatch"
    assert jnp.allclose(logvar, lv_ref, atol=2e-2, rtol=0), "logvar mismatch"
    assert jnp.allclose(x_recon.astype(jnp.float32), xr_ref, atol=2e-2, rtol=0), "x_recon mismatch"

    print("KERNEL_OK")
</pallas_src>

<mosaic_0001>
module attributes {stable_mosaic.version = 11 : i64} {
  func.func @vae_kernel(%arg0: i32, %arg1: memref<8x784xf32, #tpu.memory_space<vmem>>, %arg2: memref<8x128xf32, #tpu.memory_space<vmem>>, %arg3: memref<784x400xbf16, #tpu.memory_space<vmem>>, %arg4: memref<1x400xf32, #tpu.memory_space<vmem>>, %arg5: memref<400x128xbf16, #tpu.memory_space<vmem>>, %arg6: memref<1x128xf32, #tpu.memory_space<vmem>>, %arg7: memref<128x400xbf16, #tpu.memory_space<vmem>>, %arg8: memref<1x400xf32, #tpu.memory_space<vmem>>, %arg9: memref<400x784xbf16, #tpu.memory_space<vmem>>, %arg10: memref<1x784xf32, #tpu.memory_space<vmem>>, %arg11: memref<8x784xbf16, #tpu.memory_space<vmem>>, %arg12: memref<8x128xf32, #tpu.memory_space<vmem>>) attributes {dimension_semantics = [#tpu.dimension_semantics<parallel>], iteration_bounds = array<i64: 1>, scalar_prefetch = 0 : i64, scratch_operands = 0 : i64, tpu.core_type = #tpu.core_type<tc>, window_params = [{transform_indices = @transform_0, window_bounds = array<i64: 8, 784>}, {transform_indices = @transform_1, window_bounds = array<i64: 8, 128>}, {pipeline_mode = #tpu.pipeline_mode<synchronous>, transform_indices = @transform_2, window_bounds = array<i64: 784, 400>}, {pipeline_mode = #tpu.pipeline_mode<synchronous>, transform_indices = @transform_3, window_bounds = array<i64: 1, 400>}, {pipeline_mode = #tpu.pipeline_mode<synchronous>, transform_indices = @transform_4, window_bounds = array<i64: 400, 128>}, {pipeline_mode = #tpu.pipeline_mode<synchronous>, transform_indices = @transform_5, window_bounds = array<i64: 1, 128>}, {pipeline_mode = #tpu.pipeline_mode<synchronous>, transform_indices = @transform_6, window_bounds = array<i64: 128, 400>}, {pipeline_mode = #tpu.pipeline_mode<synchronous>, transform_indices = @transform_7, window_bounds = array<i64: 1, 400>}, {pipeline_mode = #tpu.pipeline_mode<synchronous>, transform_indices = @transform_8, window_bounds = array<i64: 400, 784>}, {pipeline_mode = #tpu.pipeline_mode<synchronous>, transform_indices = @transform_9, window_bounds = array<i64: 1, 784>}, {transform_indices = @transform_10, window_bounds = array<i64: 8, 784>}, {transform_indices = @transform_11, window_bounds = array<i64: 8, 128>}]} {
    %c0 = arith.constant 0 : index
    %c0_0 = arith.constant 0 : index
    %0 = vector.load %arg1[%c0, %c0_0] : memref<8x784xf32, #tpu.memory_space<vmem>>, vector<8x784xf32>
    %1 = arith.truncf %0 : vector<8x784xf32> to vector<8x784xbf16>
    %c0_1 = arith.constant 0 : index
    %c0_2 = arith.constant 0 : index
    %2 = vector.load %arg3[%c0_1, %c0_2] : memref<784x400xbf16, #tpu.memory_space<vmem>>, vector<784x400xbf16>
    %cst = arith.constant dense<0.000000e+00> : vector<8x400xf32>
    %3 = tpu.matmul %1, %2, %cst {dimension_numbers = #tpu.dot_dimension_numbers<[1], [0], [0], [1], [0, 0, 1, 1], [], []>} : vector<8x784xbf16>, vector<784x400xbf16>, vector<8x400xf32> -> vector<8x400xf32>
    %c0_3 = arith.constant 0 : index
    %c0_4 = arith.constant 0 : index
    %4 = vector.load %arg4[%c0_3, %c0_4] : memref<1x400xf32, #tpu.memory_space<vmem>>, vector<1x400xf32>
    %5 = vector.broadcast %4 : vector<1x400xf32> to vector<8x400xf32>
    %6 = arith.addf %3, %5 : vector<8x400xf32>
    %cst_5 = arith.constant 0.000000e+00 : f32
    %7 = vector.broadcast %cst_5 : f32 to vector<8x400xf32>
    %8 = arith.maximumf %6, %7 : vector<8x400xf32>
    %9 = arith.truncf %8 : vector<8x400xf32> to vector<8x400xbf16>
    %c0_6 = arith.constant 0 : index
    %c0_7 = arith.constant 0 : index
    %10 = vector.load %arg5[%c0_6, %c0_7] : memref<400x128xbf16, #tpu.memory_space<vmem>>, vector<400x128xbf16>
    %cst_8 = arith.constant dense<0.000000e+00> : vector<8x128xf32>
    %11 = tpu.matmul %9, %10, %cst_8 {dimension_numbers = #tpu.dot_dimension_numbers<[1], [0], [0], [1], [0, 0, 1, 1], [], []>} : vector<8x400xbf16>, vector<400x128xbf16>, vector<8x128xf32> -> vector<8x128xf32>
    %c0_9 = arith.constant 0 : index
    %c0_10 = arith.constant 0 : index
    %12 = vector.load %arg6[%c0_9, %c0_10] : memref<1x128xf32, #tpu.memory_space<vmem>>, vector<1x128xf32>
    %13 = vector.broadcast %12 : vector<1x128xf32> to vector<8x128xf32>
    %14 = arith.addf %11, %13 : vector<8x128xf32>
    %c0_11 = arith.constant 0 : index
    %c0_12 = arith.constant 0 : index
    %15 = vector.load %arg12[%c0_11, %c0_12] : memref<8x128xf32, #tpu.memory_space<vmem>>, vector<8x128xf32>
    tpu.vector_store %arg12[%c0_11, %c0_12], %14 {strides = array<i32>} : memref<8x128xf32, #tpu.memory_space<vmem>>, vector<8x128xf32>,
    %16 = tpu.iota {dimensions = array<i32: 1>} : vector<8x128xi32>
    %c64_i32 = arith.constant 64 : i32
    %17 = tpu.dynamic_rotate %14 by %c64_i32 dim 1 : vector<8x128xf32>, i32 -> vector<8x128xf32>
    %c64_i32_13 = arith.constant 64 : i32
    %18 = vector.broadcast %c64_i32_13 : i32 to vector<8x128xi32>
    %19 = arith.cmpi slt, %16, %18 : vector<8x128xi32>
    %cst_14 = arith.constant 0.000000e+00 : f32
    %20 = vector.broadcast %cst_14 : f32 to vector<8x128xf32>
    %21 = arith.select %19, %17, %20 : vector<8x128xi1>, vector<8x128xf32>
    %cst_15 = arith.constant 5.000000e-01 : f32
    %22 = vector.broadcast %cst_15 : f32 to vector<8x128xf32>
    %23 = arith.mulf %22, %21 : vector<8x128xf32>
    %24 = math.exp %23 : vector<8x128xf32>
    %c0_16 = arith.constant 0 : index
    %c0_17 = arith.constant 0 : index
    %25 = vector.load %arg2[%c0_16, %c0_17] : memref<8x128xf32, #tpu.memory_space<vmem>>, vector<8x128xf32>
    %26 = arith.mulf %25, %24 : vector<8x128xf32>
    %27 = arith.addf %14, %26 : vector<8x128xf32>
    %28 = arith.truncf %27 : vector<8x128xf32> to vector<8x128xbf16>
    %c0_18 = arith.constant 0 : index
    %c0_19 = arith.constant 0 : index
    %29 = vector.load %arg7[%c0_18, %c0_19] : memref<128x400xbf16, #tpu.memory_space<vmem>>, vector<128x400xbf16>
    %cst_20 = arith.constant dense<0.000000e+00> : vector<8x400xf32>
    %30 = tpu.matmul %28, %29, %cst_20 {dimension_numbers = #tpu.dot_dimension_numbers<[1], [0], [0], [1], [0, 0, 1, 1], [], []>} : vector<8x128xbf16>, vector<128x400xbf16>, vector<8x400xf32> -> vector<8x400xf32>
    %c0_21 = arith.constant 0 : index
    %c0_22 = arith.constant 0 : index
    %31 = vector.load %arg8[%c0_21, %c0_22] : memref<1x400xf32, #tpu.memory_space<vmem>>, vector<1x400xf32>
    %32 = vector.broadcast %31 : vector<1x400xf32> to vector<8x400xf32>
    %33 = arith.addf %30, %32 : vector<8x400xf32>
    %cst_23 = arith.constant 0.000000e+00 : f32
    %34 = vector.broadcast %cst_23 : f32 to vector<8x400xf32>
    %35 = arith.maximumf %33, %34 : vector<8x400xf32>
    %36 = arith.truncf %35 : vector<8x400xf32> to vector<8x400xbf16>
    %c0_24 = arith.constant 0 : index
    %c0_25 = arith.constant 0 : index
    %37 = vector.load %arg9[%c0_24, %c0_25] : memref<400x784xbf16, #tpu.memory_space<vmem>>, vector<400x784xbf16>
    %cst_26 = arith.constant dense<0.000000e+00> : vector<8x784xf32>
    %38 = tpu.matmul %36, %37, %cst_26 {dimension_numbers = #tpu.dot_dimension_numbers<[1], [0], [0], [1], [0, 0, 1, 1], [], []>} : vector<8x400xbf16>, vector<400x784xbf16>, vector<8x784xf32> -> vector<8x784xf32>
    %c0_27 = arith.constant 0 : index
    %c0_28 = arith.constant 0 : index
    %39 = vector.load %arg10[%c0_27, %c0_28] : memref<1x784xf32, #tpu.memory_space<vmem>>, vector<1x784xf32>
    %40 = vector.broadcast %39 : vector<1x784xf32> to vector<8x784xf32>
    %41 = arith.addf %38, %40 : vector<8x784xf32>
    %cst_29 = arith.constant 5.000000e-01 : f32
    %42 = vector.broadcast %cst_29 : f32 to vector<8x784xf32>
    %43 = arith.mulf %42, %41 : vector<8x784xf32>
    %44 = math.tanh %43 : vector<8x784xf32>
    %cst_30 = arith.constant 5.000000e-01 : f32
    %45 = vector.broadcast %cst_30 : f32 to vector<8x784xf32>
    %46 = arith.mulf %45, %44 : vector<8x784xf32>
    %cst_31 = arith.constant 5.000000e-01 : f32
    %47 = vector.broadcast %cst_31 : f32 to vector<8x784xf32>
    %48 = arith.addf %47, %46 : vector<8x784xf32>
    %49 = arith.truncf %48 : vector<8x784xf32> to vector<8x784xbf16>
    %c0_32 = arith.constant 0 : index
    %c0_33 = arith.constant 0 : index
    %50 = vector.load %arg11[%c0_32, %c0_33] : memref<8x784xbf16, #tpu.memory_space<vmem>>, vector<8x784xbf16>
    tpu.vector_store %arg11[%c0_32, %c0_33], %49 {strides = array<i32>} : memref<8x784xbf16, #tpu.memory_space<vmem>>, vector<8x784xbf16>,
    return
  }
  func.func @transform_0(%arg0: i32) -> (i32, i32) {
    %c0_i32 = arith.constant 0 : i32
    %c0_i32_0 = arith.constant 0 : i32
    return %arg0, %c0_i32 : i32, i32
  }
  func.func @transform_1(%arg0: i32) -> (i32, i32) {
    %c0_i32 = arith.constant 0 : i32
    %c0_i32_0 = arith.constant 0 : i32
    return %arg0, %c0_i32 : i32, i32
  }
  func.func @transform_2(%arg0: i32) -> (i32, i32) {
    %c0_i32 = arith.constant 0 : i32
    %c0_i32_0 = arith.constant 0 : i32
    %c0_i32_1 = arith.constant 0 : i32
    return %c0_i32, %c0_i32_0 : i32, i32
  }
  func.func @transform_3(%arg0: i32) -> (i32, i32) {
    %c0_i32 = arith.constant 0 : i32
    %c0_i32_0 = arith.constant 0 : i32
    %c0_i32_1 = arith.constant 0 : i32
    return %c0_i32, %c0_i32_0 : i32, i32
  }
  func.func @transform_4(%arg0: i32) -> (i32, i32) {
    %c0_i32 = arith.constant 0 : i32
    %c0_i32_0 = arith.constant 0 : i32
    %c0_i32_1 = arith.constant 0 : i32
    return %c0_i32, %c0_i32_0 : i32, i32
  }
  func.func @transform_5(%arg0: i32) -> (i32, i32) {
    %c0_i32 = arith.constant 0 : i32
    %c0_i32_0 = arith.constant 0 : i32
    %c0_i32_1 = arith.constant 0 : i32
    return %c0_i32, %c0_i32_0 : i32, i32
  }
  func.func @transform_6(%arg0: i32) -> (i32, i32) {
    %c0_i32 = arith.constant 0 : i32
    %c0_i32_0 = arith.constant 0 : i32
    %c0_i32_1 = arith.constant 0 : i32
    return %c0_i32, %c0_i32_0 : i32, i32
  }
  func.func @transform_7(%arg0: i32) -> (i32, i32) {
    %c0_i32 = arith.constant 0 : i32
    %c0_i32_0 = arith.constant 0 : i32
    %c0_i32_1 = arith.constant 0 : i32
    return %c0_i32, %c0_i32_0 : i32, i32
  }
  func.func @transform_8(%arg0: i32) -> (i32, i32) {
    %c0_i32 = arith.constant 0 : i32
    %c0_i32_0 = arith.constant 0 : i32
    %c0_i32_1 = arith.constant 0 : i32
    return %c0_i32, %c0_i32_0 : i32, i32
  }
  func.func @transform_9(%arg0: i32) -> (i32, i32) {
    %c0_i32 = arith.constant 0 : i32
    %c0_i32_0 = arith.constant 0 : i32
    %c0_i32_1 = arith.constant 0 : i32
    return %c0_i32, %c0_i32_0 : i32, i32
  }
  func.func @transform_10(%arg0: i32) -> (i32, i32) {
    %c0_i32 = arith.constant 0 : i32
    %c0_i32_0 = arith.constant 0 : i32
    return %arg0, %c0_i32 : i32, i32
  }
  func.func @transform_11(%arg0: i32) -> (i32, i32) {
    %c0_i32 = arith.constant 0 : i32
    %c0_i32_0 = arith.constant 0 : i32
    return %arg0, %c0_i32 : i32, i32
  }
}

</mosaic_0001>

<bundles_post_ra>
// kernel: tpu_custom_call.1
= control target key start
LH: loop header
LB: loop body
LE: loop exit
PB: predicated region body
PF: predicated region fallthrough
CT: control target
= control target key end

     0   :  { %17 = vsyncpa [#allocation3], 0  ;;  %vm1252_vm0 = vcmask 130048   ;;  %s6436_s0 = inlined_call_operand.vmem [shape: f32[8,784], index: 0, kind: input, shape index: {}]   ;;  %s6437_s1 = inlined_call_operand.vmem [shape: f32[8,128], index: 1, kind: input, shape index: {}]   ;;  %s6438_s2 = inlined_call_operand.vmem [shape: bf16[784,400], index: 2, kind: input, shape index: {}]   ;;  %s6439_s3 = inlined_call_operand.vmem [shape: f32[1,400], index: 3, kind: input, shape index: {}]   ;;  %s6440_s4 = inlined_call_operand.vmem [shape: bf16[400,128], index: 4, kind: input, shape index: {}]   ;;  %s6441_s5 = inlined_call_operand.vmem [shape: f32[1,128], index: 5, kind: input, shape index: {}]   ;;  %s6442_s6 = inlined_call_operand.vmem [shape: bf16[128,400], index: 6, kind: input, shape index: {}]   ;;  %s6443_s7 = inlined_call_operand.vmem [shape: f32[1,400], index: 7, kind: input, shape index: {}]   ;;  %s6444_s8 = inlined_call_operand.vmem [shape: bf16[400,784], index: 8, kind: input, shape index: {}]   ;;  %s6445_s9 = inlined_call_operand.vmem [shape: f32[1,784], index: 9, kind: input, shape index: {}]   ;;  %s6446_s10 = inlined_call_operand.hbm [shape: bf16[8,784], index: 10, kind: output, shape index: {0}]   ;;  %s6447_s11 = inlined_call_operand.hbm [shape: f32[8,128], index: 11, kind: output, shape index: {1}]  }
   0x1   :  { %v4248_v0 = vld [vmem:[%s6438_s2 + $0xe4] ss:$16 sps:$4 sm:$0xff]   ;;  %v4252_v2 = vld [vmem:[%s6438_s2 + $0xe0] ss:$16 sps:$4 sm:$0xff]   ;;  %v41_v46 = vld [vmem:[%s6436_s0 + $0x8] sm:$0xff] }
   0x2   :  { %v4250_v1 = vld [vmem:[%s6438_s2 + $0x2e4] ss:$16 sps:$4 sm:$0xff]   ;;  %1256 = vmatprep.subr.bf16.mxu0 %v4248_v0  ;;  %v4253_v3 = vld [vmem:[%s6438_s2 + $0x2e0] ss:$16 sps:$4 sm:$0xff]   ;;  %v5136_v49 = vpack.c.bf16 %v41_v46, %v41_v46  ;;  %v43_v50 = vld [vmem:[%s6436_s0 + $0x18] sm:$0xff] }
   0x3   :  { %1297 = vmatprep.subr.bf16.mxu1 %v4250_v1  ;;  %v4254_v4 = vld [vmem:[%s6438_s2 + $0xc4] ss:$16 sps:$4 sm:$0xff]   ;;  %1257 = vmatpush1.bf16.msra.mxu0 %v4252_v2  ;;  %v4258_v6 = vld [vmem:[%s6438_s2 + $0xc0] ss:$16 sps:$4 sm:$0xff]   ;;  %v5144_v52 = vpack.c.bf16 %v43_v50, %v43_v50 }
   0x4   :  { %1298 = vmatpush1.bf16.msra.mxu1 %v4253_v3  ;;  %v4256_v5 = vld [vmem:[%s6438_s2 + $0x2c4] ss:$16 sps:$4 sm:$0xff]   ;;  %1258 = vmatprep.subr.bf16.mxu0 %v4254_v4  ;;  %v4259_v7 = vld [vmem:[%s6438_s2 + $0x2c0] ss:$16 sps:$4 sm:$0xff]  }
   0x5   :  { %1299 = vmatprep.subr.bf16.mxu1 %v4256_v5  ;;  %v4260_v8 = vld [vmem:[%s6438_s2 + $0xa4] ss:$16 sps:$4 sm:$0xff]   ;;  %v4264_v10 = vld [vmem:[%s6438_s2 + $0xa0] ss:$16 sps:$4 sm:$0xff]   ;;  %1288 = vmatprep.mubr.bf16.mxu0 %v5136_v49 }
   0x6   :  { %v4262_v9 = vld [vmem:[%s6438_s2 + $0x2a4] ss:$16 sps:$4 sm:$0xff]   ;;  %v4265_v11 = vld [vmem:[%s6438_s2 + $0x2a0] ss:$16 sps:$4 sm:$0xff]   ;;  %1329 = vmatprep.mubr.bf16.mxu1 %v5144_v52 }
   0x7   :  { %1259 = vmatpush1.bf16.msra.mxu0 %v4258_v6  ;;  %v4266_v12 = vld [vmem:[%s6438_s2 + $0x84] ss:$16 sps:$4 sm:$0xff]   ;;  %v4270_v14 = vld [vmem:[%s6438_s2 + $0x80] ss:$16 sps:$4 sm:$0xff]  }
   0x8   :  { %1300 = vmatpush1.bf16.msra.mxu1 %v4259_v7  ;;  %1260 = vmatprep.subr.bf16.mxu0 %v4260_v8  ;;  %v4268_v13 = vld [vmem:[%s6438_s2 + $0x284] ss:$16 sps:$4 sm:$0xff]   ;;  %v4271_v15 = vld [vmem:[%s6438_s2 + $0x280] ss:$16 sps:$4 sm:$0xff]  }
   0x9   :  { %1301 = vmatprep.subr.bf16.mxu1 %v4262_v9  ;;  %v4272_v16 = vld [vmem:[%s6438_s2 + $0x64] ss:$16 sps:$4 sm:$0xff]   ;;  %v4276_v18 = vld [vmem:[%s6438_s2 + $0x60] ss:$16 sps:$4 sm:$0xff]  }
   0xa   :  { %v4274_v17 = vld [vmem:[%s6438_s2 + $0x264] ss:$16 sps:$4 sm:$0xff]   ;;  %v4277_v19 = vld [vmem:[%s6438_s2 + $0x260] ss:$16 sps:$4 sm:$0xff]  }
   0xb   :  { %1261 = vmatpush1.bf16.msra.mxu0 %v4264_v10  ;;  %v4278_v20 = vld [vmem:[%s6438_s2 + $0x44] ss:$16 sps:$4 sm:$0xff]   ;;  %v4282_v22 = vld [vmem:[%s6438_s2 + $0x40] ss:$16 sps:$4 sm:$0xff]  }
   0xc   :  { %1302 = vmatpush1.bf16.msra.mxu1 %v4265_v11  ;;  %1262 = vmatprep.subr.bf16.mxu0 %v4266_v12  ;;  %v4280_v21 = vld [vmem:[%s6438_s2 + $0x244] ss:$16 sps:$4 sm:$0xff]   ;;  %v4283_v23 = vld [vmem:[%s6438_s2 + $0x240] ss:$16 sps:$4 sm:$0xff]  }
   0xd   :  { %1303 = vmatprep.subr.bf16.mxu1 %v4268_v13  ;;  %v4284_v24 = vld [vmem:[%s6438_s2 + $0x24] ss:$16 sps:$4 sm:$0xff]   ;;  %v4288_v26 = vld [vmem:[%s6438_s2 + $0x20] ss:$16 sps:$4 sm:$0xff]   ;;  %v4355_v13 = vld [vmem:[%s6438_s2 + $0xec] ss:$16 sps:$4 sm:$0xff]  }
   0xe   :  { %v4286_v25 = vld [vmem:[%s6438_s2 + $0x224] ss:$16 sps:$4 sm:$0xff]   ;;  %v4289_v27 = vld [vmem:[%s6438_s2 + $0x220] ss:$16 sps:$4 sm:$0xff]  }
   0xf   :  { %1263 = vmatpush1.bf16.msra.mxu0 %v4270_v14  ;;  %v4290_v28 = vld [vmem:[%s6438_s2 + $0x4] ss:$16 sps:$4 sm:$0xff]   ;;  %v4294_v30 = vld [vmem:[%s6438_s2] ss:$16 sps:$4 sm:$0xff]  }
  0x10   :  { %1304 = vmatpush1.bf16.msra.mxu1 %v4271_v15  ;;  %1264 = vmatprep.subr.bf16.mxu0 %v4272_v16  ;;  %v4292_v29 = vld [vmem:[%s6438_s2 + $0x204] ss:$16 sps:$4 sm:$0xff]   ;;  %v4295_v31 = vld [vmem:[%s6438_s2 + $0x200] ss:$16 sps:$4 sm:$0xff]   ;;  %v4925_v16 = vmov 0  }
  0x11   :  { %1305 = vmatprep.subr.bf16.mxu1 %v4274_v17  ;;  %v4296_v32 = vld [vmem:[%s6438_s2 + $0x1e4] ss:$16 sps:$4 sm:$0xff]   ;;  %v4300_v34 = vld [vmem:[%s6438_s2 + $0x1e0] ss:$16 sps:$4 sm:$0xff]  }
  0x12   :  { %v4298_v33 = vld [vmem:[%s6438_s2 + $0x3e4] ss:$16 sps:$4 sm:$0xff]   ;;  %v4301_v35 = vld [vmem:[%s6438_s2 + $0x3e0] ss:$16 sps:$4 sm:$0xff]  }
  0x13   :  { %1265 = vmatpush1.bf16.msra.mxu0 %v4276_v18  ;;  %v4302_v36 = vld [vmem:[%s6438_s2 + $0x1c4] ss:$16 sps:$4 sm:$0xff]   ;;  %v4306_v38 = vld [vmem:[%s6438_s2 + $0x1c0] ss:$16 sps:$4 sm:$0xff]   ;;  %v4353_v18 = vld [vmem:[%s6438_s2 + $0xe8] ss:$16 sps:$4 sm:$0xff]  }
  0x14   :  { %1306 = vmatpush1.bf16.msra.mxu1 %v4277_v19  ;;  %1266 = vmatprep.subr.bf16.mxu0 %v4278_v20  ;;  %v4304_v37 = vld [vmem:[%s6438_s2 + $0x3c4] ss:$16 sps:$4 sm:$0xff]   ;;  %v4307_v39 = vld [vmem:[%s6438_s2 + $0x3c0] ss:$16 sps:$4 sm:$0xff]  }
  0x15   :  { %1307 = vmatprep.subr.bf16.mxu1 %v4280_v21  ;;  %v4308_v40 = vld [vmem:[%s6438_s2 + $0x1a4] ss:$16 sps:$4 sm:$0xff]   ;;  %v4312_v42 = vld [vmem:[%s6438_s2 + $0x1a0] ss:$16 sps:$4 sm:$0xff]   ;;  %v4361_v21 = vld [vmem:[%s6438_s2 + $0xcc] ss:$16 sps:$4 sm:$0xff]  }
  0x16   :  { %v4310_v41 = vld [vmem:[%s6438_s2 + $0x3a4] ss:$16 sps:$4 sm:$0xff]   ;;  %v4313_v43 = vld [vmem:[%s6438_s2 + $0x3a0] ss:$16 sps:$4 sm:$0xff]  }
  0x17   :  { %1267 = vmatpush1.bf16.msra.mxu0 %v4282_v22  ;;  %v4314_v44 = vld [vmem:[%s6438_s2 + $0x184] ss:$16 sps:$4 sm:$0xff]   ;;  %v4318_v47 = vld [vmem:[%s6438_s2 + $0x180] ss:$16 sps:$4 sm:$0xff]  }
  0x18   :  { %1308 = vmatpush1.bf16.msra.mxu1 %v4283_v23  ;;  %1268 = vmatprep.subr.bf16.mxu0 %v4284_v24  ;;  %v4316_v45 = vld [vmem:[%s6438_s2 + $0x384] ss:$16 sps:$4 sm:$0xff]   ;;  %v4319_v48 = vld [vmem:[%s6438_s2 + $0x380] ss:$16 sps:$4 sm:$0xff]   ;;  %v4359_v23 = vld [vmem:[%s6438_s2 + $0xc8] ss:$16 sps:$4 sm:$0xff]  }
  0x19   :  { %1309 = vmatprep.subr.bf16.mxu1 %v4286_v25  ;;  %v4320_v51 = vld [vmem:[%s6438_s2 + $0x164] ss:$16 sps:$4 sm:$0xff]   ;;  %v4324_v54 = vld [vmem:[%s6438_s2 + $0x160] ss:$16 sps:$4 sm:$0xff]   ;;  %v4367_v25 = vld [vmem:[%s6438_s2 + $0xac] ss:$16 sps:$4 sm:$0xff]  }
  0x1a   :  { %v4322_v53 = vld [vmem:[%s6438_s2 + $0x364] ss:$16 sps:$4 sm:$0xff]   ;;  %v4325_v55 = vld [vmem:[%s6438_s2 + $0x360] ss:$16 sps:$4 sm:$0xff]  }
  0x1b   :  { %1269 = vmatpush1.bf16.msra.mxu0 %v4288_v26  ;;  %v4326_v56 = vld [vmem:[%s6438_s2 + $0x144] ss:$16 sps:$4 sm:$0xff]   ;;  %v4330_v58 = vld [vmem:[%s6438_s2 + $0x140] ss:$16 sps:$4 sm:$0xff]  }
  0x1c   :  { %1310 = vmatpush1.bf16.msra.mxu1 %v4289_v27  ;;  %1270 = vmatprep.subr.bf16.mxu0 %v4290_v28  ;;  %v4328_v57 = vld [vmem:[%s6438_s2 + $0x344] ss:$16 sps:$4 sm:$0xff]   ;;  %v4331_v59 = vld [vmem:[%s6438_s2 + $0x340] ss:$16 sps:$4 sm:$0xff]   ;;  %v4365_v27 = vld [vmem:[%s6438_s2 + $0xa8] ss:$16 sps:$4 sm:$0xff]  }
  0x1d   :  { %1311 = vmatprep.subr.bf16.mxu1 %v4292_v29  ;;  %v4332_v60 = vld [vmem:[%s6438_s2 + $0x124] ss:$16 sps:$4 sm:$0xff]   ;;  %v4336_v62 = vld [vmem:[%s6438_s2 + $0x120] ss:$16 sps:$4 sm:$0xff]   ;;  %v4373_v29 = vld [vmem:[%s6438_s2 + $0x8c] ss:$16 sps:$4 sm:$0xff]  }
  0x1e   :  { %v4334_v61 = vld [vmem:[%s6438_s2 + $0x324] ss:$16 sps:$4 sm:$0xff]   ;;  %v4337_v63 = vld [vmem:[%s6438_s2 + $0x320] ss:$16 sps:$4 sm:$0xff]  }
  0x1f   :  { %1271 = vmatpush1.bf16.msra.mxu0 %v4294_v30  ;;  %v4338_v0 = vld [vmem:[%s6438_s2 + $0x104] ss:$16 sps:$4 sm:$0xff]   ;;  %v4342_v2 = vld [vmem:[%s6438_s2 + $0x100] ss:$16 sps:$4 sm:$0xff]  }
  0x20   :  { %1312 = vmatpush1.bf16.msra.mxu1 %v4295_v31  ;;  %1272 = vmatprep.subr.bf16.mxu0 %v4296_v32  ;;  %v4340_v1 = vld [vmem:[%s6438_s2 + $0x304] ss:$16 sps:$4 sm:$0xff]   ;;  %v4343_v3 = vld [vmem:[%s6438_s2 + $0x300] ss:$16 sps:$4 sm:$0xff]   ;;  %v4371_v31 = vld [vmem:[%s6438_s2 + $0x88] ss:$16 sps:$4 sm:$0xff]  }
  0x21   :  { %1313 = vmatprep.subr.bf16.mxu1 %v4298_v33  ;;  %v40_v4 = vld [vmem:[%s6436_s0] sm:$0xff]  ;;  %v42_v5 = vld [vmem:[%s6436_s0 + $0x10] sm:$0xff]  ;;  %v4379_v33 = vld [vmem:[%s6438_s2 + $0x6c] ss:$16 sps:$4 sm:$0xff]  }
  0x22   :  { %v4346_v6 = vld [vmem:[%s6438_s2 + $0x4e4] ss:$16 sps:$4 sm:$0xff]   ;;  %v5205_v8 = vpack.c.bf16 %v40_v4, %v40_v4  ;;  %v5207_v9 = vpack.c.bf16 %v42_v5, %v42_v5  ;;  %v4344_v10 = vld [vmem:[%s6438_s2 + $0x4e0] ss:$16 sps:$4 sm:$0xff]   ;;  %v4427_v4 = vld [vmem:[%s6438_s2 + $0x16c] ss:$16 sps:$4 sm:$0xff]  }
  0x23   :  { %1273 = vmatpush2.bf16.msra.mxu0 %v4300_v34  ;;  %v4349_v7 = vld [vmem:[%s6438_s2 + $0x604] ss:$16 sps:$4 sm:$0xff]   ;;  %v4347_v11 = vld [vmem:[%s6438_s2 + $0x600] ss:$16 sps:$4 sm:$0xff]  }
  0x24   :  { %1314 = vmatpush2.bf16.msra.mxu1 %v4301_v35  ;;  %1274 = vmatprep.subr.bf16.mxu0 %v4302_v36  ;;  %v4352_v12 = vld [vmem:[%s6438_s2 + $0x4c4] ss:$16 sps:$4 sm:$0xff]   ;;  %v4350_v14 = vld [vmem:[%s6438_s2 + $0x4c0] ss:$16 sps:$4 sm:$0xff]   ;;  %v45_v35 = vld [vmem:[%s6436_s0 + $0x28] sm:$0xff] }
  0x25   :  { %1315 = vmatprep.subr.bf16.mxu1 %v4304_v37  ;;  %v46_v15 = vld [vmem:[%s6436_s0 + $0x30] sm:$0xff]  ;;  %v5289_v36 = vpack.c.bf16 %v45_v35, %v45_v35  ;;  %v4377_v37 = vld [vmem:[%s6438_s2 + $0x68] ss:$16 sps:$4 sm:$0xff]  }
  0x26   :  { %v4358_v17 = vld [vmem:[%s6438_s2 + $0x4a4] ss:$16 sps:$4 sm:$0xff]   ;;  %v5236_v19 = vpack.c.bf16 %v46_v15, %v46_v15  ;;  %v4356_v20 = vld [vmem:[%s6438_s2 + $0x4a0] ss:$16 sps:$4 sm:$0xff]   ;;  %v4461_v35 = vld [vmem:[%s6438_s2 + $0x4a8] ss:$16 sps:$4 sm:$0xff]  }
  0x27   :  { %1275 = vmatpush2.bf16.msra.mxu0 %v4306_v38  ;;  %v4364_v22 = vld [vmem:[%s6438_s2 + $0x484] ss:$16 sps:$4 sm:$0xff]   ;;  %v4362_v24 = vld [vmem:[%s6438_s2 + $0x480] ss:$16 sps:$4 sm:$0xff]  }
  0x28   :  { %1316 = vmatpush2.bf16.msra.mxu1 %v4307_v39  ;;  %1276 = vmatprep.subr.bf16.mxu0 %v4308_v40  ;;  %v4370_v26 = vld [vmem:[%s6438_s2 + $0x464] ss:$16 sps:$4 sm:$0xff]   ;;  %v4368_v28 = vld [vmem:[%s6438_s2 + $0x460] ss:$16 sps:$4 sm:$0xff]   ;;  %v4385_v39 = vld [vmem:[%s6438_s2 + $0x4c] ss:$16 sps:$4 sm:$0xff]  }
  0x29   :  { %1317 = vmatprep.subr.bf16.mxu1 %v4310_v41  ;;  %v4376_v30 = vld [vmem:[%s6438_s2 + $0x444] ss:$16 sps:$4 sm:$0xff]   ;;  %v4374_v32 = vld [vmem:[%s6438_s2 + $0x440] ss:$16 sps:$4 sm:$0xff]   ;;  %v4383_v41 = vld [vmem:[%s6438_s2 + $0x48] ss:$16 sps:$4 sm:$0xff]  }
  0x2a   :  { %v4382_v34 = vld [vmem:[%s6438_s2 + $0x424] ss:$16 sps:$4 sm:$0xff]   ;;  %v4380_v38 = vld [vmem:[%s6438_s2 + $0x420] ss:$16 sps:$4 sm:$0xff]  }
  0x2b   :  { %1277 = vmatpush2.bf16.msra.mxu0 %v4312_v42  ;;  %v4388_v40 = vld [vmem:[%s6438_s2 + $0x404] ss:$16 sps:$4 sm:$0xff]   ;;  %v4386_v42 = vld [vmem:[%s6438_s2 + $0x400] ss:$16 sps:$4 sm:$0xff]  }
  0x2c   :  { %1318 = vmatpush2.bf16.msra.mxu1 %v4313_v43  ;;  %1278 = vmatprep.subr.bf16.mxu0 %v4314_v44  ;;  %v4391_v43 = vld [vmem:[%s6438_s2 + $0x2c] ss:$16 sps:$4 sm:$0xff]   ;;  %v4394_v44 = vld [vmem:[%s6438_s2 + $0x5e4] ss:$16 sps:$4 sm:$0xff]   ;;  %v4392_v46 = vld [vmem:[%s6438_s2 + $0x5e0] ss:$16 sps:$4 sm:$0xff]  }
  0x2d   :  { %1319 = vmatprep.subr.bf16.mxu1 %v4316_v45  ;;  %v4389_v45 = vld [vmem:[%s6438_s2 + $0x28] ss:$16 sps:$4 sm:$0xff]   ;;  %v4398_v50 = vld [vmem:[%s6438_s2 + $0x5c0] ss:$16 sps:$4 sm:$0xff]   ;;  %v4430_v5 = vld [vmem:[%s6438_s2 + $0x524] ss:$16 sps:$4 sm:$0xff]  }
  0x2e   :  { %v44_v15 = vld [vmem:[%s6436_s0 + $0x20] sm:$0xff] }
  0x2f   :  { %1279 = vmatpush2.bf16.msra.mxu0 %v4318_v47  ;;  %v4397_v47 = vld [vmem:[%s6438_s2 + $0xc] ss:$16 sps:$4 sm:$0xff]  }
  0x30   :  { %1320 = vmatpush2.bf16.msra.mxu1 %v4319_v48  ;;  %1280 = vmatprep.subr.bf16.mxu0 %v4320_v51  ;;  %v4400_v48 = vld [vmem:[%s6438_s2 + $0x5c4] ss:$16 sps:$4 sm:$0xff]   ;;  %v4403_v51 = vld [vmem:[%s6438_s2 + $0x1ec] ss:$16 sps:$4 sm:$0xff]  }
  0x31   :  { %1321 = vmatprep.subr.bf16.mxu1 %v4322_v53  ;;  %v4406_v53 = vld [vmem:[%s6438_s2 + $0x5a4] ss:$16 sps:$4 sm:$0xff]  }
  0x33   :  { %1281 = vmatpush2.bf16.msra.mxu0 %v4324_v54  ;;  %v4401_v54 = vld [vmem:[%s6438_s2 + $0x1e8] ss:$16 sps:$4 sm:$0xff]  }
  0x34   :  { %1322 = vmatpush2.bf16.msra.mxu1 %v4325_v55  ;;  %1282 = vmatprep.subr.bf16.mxu0 %v4326_v56  ;;  %v4404_v55 = vld [vmem:[%s6438_s2 + $0x5a0] ss:$16 sps:$4 sm:$0xff]   ;;  %v4409_v56 = vld [vmem:[%s6438_s2 + $0x1cc] ss:$16 sps:$4 sm:$0xff]  }
  0x35   :  { %1323 = vmatprep.subr.bf16.mxu1 %v4328_v57  ;;  %v4412_v57 = vld [vmem:[%s6438_s2 + $0x584] ss:$16 sps:$4 sm:$0xff]  }
  0x37   :  { %1283 = vmatpush2.bf16.msra.mxu0 %v4330_v58  ;;  %v4407_v58 = vld [vmem:[%s6438_s2 + $0x1c8] ss:$16 sps:$4 sm:$0xff]  }
  0x38   :  { %1324 = vmatpush2.bf16.msra.mxu1 %v4331_v59  ;;  %1284 = vmatprep.subr.bf16.mxu0 %v4332_v60  ;;  %v4410_v59 = vld [vmem:[%s6438_s2 + $0x580] ss:$16 sps:$4 sm:$0xff]   ;;  %v4415_v60 = vld [vmem:[%s6438_s2 + $0x1ac] ss:$16 sps:$4 sm:$0xff]  }
  0x39   :  { %1325 = vmatprep.subr.bf16.mxu1 %v4334_v61  ;;  %v4418_v61 = vld [vmem:[%s6438_s2 + $0x564] ss:$16 sps:$4 sm:$0xff]  }
  0x3b   :  { %1285 = vmatpush2.bf16.msra.mxu0 %v4336_v62  ;;  %v4413_v62 = vld [vmem:[%s6438_s2 + $0x1a8] ss:$16 sps:$4 sm:$0xff]  }
  0x3c   :  { %1326 = vmatpush2.bf16.msra.mxu1 %v4337_v63  ;;  %1286 = vmatprep.subr.bf16.mxu0 %v4338_v0  ;;  %v4416_v63 = vld [vmem:[%s6438_s2 + $0x560] ss:$16 sps:$4 sm:$0xff]   ;;  %v4421_v0 = vld [vmem:[%s6438_s2 + $0x18c] ss:$16 sps:$4 sm:$0xff]  }
  0x3d   :  { %1327 = vmatprep.subr.bf16.mxu1 %v4340_v1  ;;  %v4424_v1 = vld [vmem:[%s6438_s2 + $0x544] ss:$16 sps:$4 sm:$0xff]  }
  0x3f   :  { %1287 = vmatpush2.bf16.msra.mxu0 %v4342_v2  ;;  %v4419_v2 = vld [vmem:[%s6438_s2 + $0x188] ss:$16 sps:$4 sm:$0xff]  }
  0x40   :  { %1328 = vmatpush2.bf16.msra.mxu1 %v4343_v3  ;;  %1338 = vmatprep.subr.bf16.mxu0 %v4346_v6  ;;  %v4422_v3 = vld [vmem:[%s6438_s2 + $0x540] ss:$16 sps:$4 sm:$0xff]   ;;  %v4425_v6 = vld [vmem:[%s6438_s2 + $0x168] ss:$16 sps:$4 sm:$0xff]  }
  0x41   :  { %1393 = vmatprep.subr.bf16.mxu1 %v4349_v7  ;;  %v4428_v7 = vld [vmem:[%s6438_s2 + $0x520] ss:$16 sps:$4 sm:$0xff]  }
  0x42   :  { %1289 = vmatmul.mubr.bf16.vlgmr.msra.gmra.mxu0 %v5205_v8 }
  0x43   :  { %1330 = vmatmul.mubr.bf16.vlgmr.msra.gmra.mxu1 %v5207_v9  ;;  %1339 = vmatpush1.bf16.msra.mxu0 %v4344_v10  ;;  %v4433_v10 = vld [vmem:[%s6438_s2 + $0x14c] ss:$16 sps:$4 sm:$0xff]  }
  0x44   :  { %1394 = vmatpush1.bf16.msra.mxu1 %v4347_v11  ;;  %1340 = vmatprep.subr.bf16.mxu0 %v4352_v12  ;;  %v4436_v11 = vld [vmem:[%s6438_s2 + $0x504] ss:$16 sps:$4 sm:$0xff]   ;;  %v4431_v12 = vld [vmem:[%s6438_s2 + $0x148] ss:$16 sps:$4 sm:$0xff]  }
  0x45   :  { %1411 = vmatprep.mubr.bf16.mxu1 %v4925_v16  ;;  %1420 = vmatprep.subr.bf16.mxu1 %v4355_v13  ;;  %v4434_v13 = vld [vmem:[%s6438_s2 + $0x500] ss:$16 sps:$4 sm:$0xff]  }
  0x46   :  { %1370 = vmatprep.mubr.bf16.mxu0 %v5289_v36 }
  0x47   :  { %1341 = vmatpush1.bf16.msra.mxu0 %v4350_v14  ;;  %v4439_v14 = vld [vmem:[%s6438_s2 + $0x12c] ss:$16 sps:$4 sm:$0xff]  }
  0x48   :  { %1342 = vmatprep.subr.bf16.mxu0 %v4358_v17  ;;  %v4442_v17 = vld [vmem:[%s6438_s2 + $0x2ec] ss:$16 sps:$4 sm:$0xff]  }
  0x4b   :  { %3952 = vmatmul.mubr.msk.bf16.vlgmr.msra.gmra.mxu1 %vm1252_vm0, %v5236_v19  ;;  %1343 = vmatpush1.bf16.msra.mxu0 %v4356_v20  ;;  %v5418_v20 = vpack.c.bf16 %v44_v15, %v44_v15  ;;  %v4529_v15 = vld [vmem:[%s6438_s2 + $0x54c] ss:$16 sps:$4 sm:$0xff]  }
  0x4c   :  { %1421 = vmatpush1.bf16.msra.mxu1 %v4353_v18  ;;  %1344 = vmatprep.subr.bf16.mxu0 %v4364_v22  ;;  %v4437_v18 = vld [vmem:[%s6438_s2 + $0x128] ss:$16 sps:$4 sm:$0xff]   ;;  %v4445_v22 = vld [vmem:[%s6438_s2 + $0x10c] ss:$16 sps:$4 sm:$0xff]  }
  0x4d   :  { %1422 = vmatprep.subr.bf16.mxu1 %v4361_v21  ;;  %1452 = vmatprep.mubr.bf16.mxu1 %v5136_v49  ;;  %v4395_v49 = vld [vmem:[%s6438_s2 + $0x8] ss:$16 sps:$4 sm:$0xff]  }
  0x4e   :  { %v4440_v21 = vld [vmem:[%s6438_s2 + $0x2e8] ss:$16 sps:$4 sm:$0xff]  }
  0x4f   :  { %1345 = vmatpush1.bf16.msra.mxu0 %v4362_v24  ;;  %v4443_v24 = vld [vmem:[%s6438_s2 + $0x108] ss:$16 sps:$4 sm:$0xff]  }
  0x50   :  { %1423 = vmatpush1.bf16.msra.mxu1 %v4359_v23  ;;  %1346 = vmatprep.subr.bf16.mxu0 %v4370_v26  ;;  %v4448_v23 = vld [vmem:[%s6438_s2 + $0x2cc] ss:$16 sps:$4 sm:$0xff]  }
  0x51   :  { %1424 = vmatprep.subr.bf16.mxu1 %v4367_v25  ;;  %v4446_v25 = vld [vmem:[%s6438_s2 + $0x2c8] ss:$16 sps:$4 sm:$0xff]   ;;  %v4451_v26 = vld [vmem:[%s6438_s2 + $0x4ec] ss:$16 sps:$4 sm:$0xff]  }
  0x53   :  { %1347 = vmatpush1.bf16.msra.mxu0 %v4368_v28  ;;  %v4449_v28 = vld [vmem:[%s6438_s2 + $0x4e8] ss:$16 sps:$4 sm:$0xff]  }
  0x54   :  { %1425 = vmatpush1.bf16.msra.mxu1 %v4365_v27  ;;  %1348 = vmatprep.subr.bf16.mxu0 %v4376_v30  ;;  %v4454_v27 = vld [vmem:[%s6438_s2 + $0x2ac] ss:$16 sps:$4 sm:$0xff]  }
  0x55   :  { %1426 = vmatprep.subr.bf16.mxu1 %v4373_v29  ;;  %v4452_v29 = vld [vmem:[%s6438_s2 + $0x2a8] ss:$16 sps:$4 sm:$0xff]   ;;  %v4457_v30 = vld [vmem:[%s6438_s2 + $0x4cc] ss:$16 sps:$4 sm:$0xff]  }
  0x57   :  { %1349 = vmatpush1.bf16.msra.mxu0 %v4374_v32  ;;  %v4455_v32 = vld [vmem:[%s6438_s2 + $0x4c8] ss:$16 sps:$4 sm:$0xff]  }
  0x58   :  { %1427 = vmatpush1.bf16.msra.mxu1 %v4371_v31  ;;  %1350 = vmatprep.subr.bf16.mxu0 %v4382_v34  ;;  %v4460_v31 = vld [vmem:[%s6438_s2 + $0x28c] ss:$16 sps:$4 sm:$0xff]  }
  0x59   :  { %1428 = vmatprep.subr.bf16.mxu1 %v4379_v33  ;;  %v4463_v33 = vld [vmem:[%s6438_s2 + $0x4ac] ss:$16 sps:$4 sm:$0xff]  }
  0x5a   :  { %v4466_v34 = vld [vmem:[%s6438_s2 + $0x26c] ss:$16 sps:$4 sm:$0xff]  }
  0x5b   :  { %1351 = vmatpush1.bf16.msra.mxu0 %v4380_v38  ;;  %v4472_v38 = vld [vmem:[%s6438_s2 + $0x24c] ss:$16 sps:$4 sm:$0xff]  }
  0x5c   :  { %1429 = vmatpush1.bf16.msra.mxu1 %v4377_v37  ;;  %1352 = vmatprep.subr.bf16.mxu0 %v4388_v40  ;;  %v4469_v37 = vld [vmem:[%s6438_s2 + $0x48c] ss:$16 sps:$4 sm:$0xff]  }
  0x5d   :  { %1430 = vmatprep.subr.bf16.mxu1 %v4385_v39  ;;  %v4467_v39 = vld [vmem:[%s6438_s2 + $0x488] ss:$16 sps:$4 sm:$0xff]   ;;  %v4475_v40 = vld [vmem:[%s6438_s2 + $0x46c] ss:$16 sps:$4 sm:$0xff]  }
  0x5f   :  { %1353 = vmatpush1.bf16.msra.mxu0 %v4386_v42  ;;  %v4473_v42 = vld [vmem:[%s6438_s2 + $0x468] ss:$16 sps:$4 sm:$0xff]  }
  0x60   :  { %1431 = vmatpush1.bf16.msra.mxu1 %v4383_v41  ;;  %1354 = vmatprep.subr.bf16.mxu0 %v4394_v44  ;;  %v4478_v41 = vld [vmem:[%s6438_s2 + $0x22c] ss:$16 sps:$4 sm:$0xff]  }
  0x61   :  { %1432 = vmatprep.subr.bf16.mxu1 %v4391_v43  ;;  %v4476_v43 = vld [vmem:[%s6438_s2 + $0x228] ss:$16 sps:$4 sm:$0xff]   ;;  %v4481_v44 = vld [vmem:[%s6438_s2 + $0x44c] ss:$16 sps:$4 sm:$0xff]  }
  0x63   :  { %1355 = vmatpush2.bf16.msra.mxu0 %v4392_v46  ;;  %v4479_v46 = vld [vmem:[%s6438_s2 + $0x448] ss:$16 sps:$4 sm:$0xff]  }
  0x64   :  { %1433 = vmatpush1.bf16.msra.mxu1 %v4389_v45  ;;  %1356 = vmatprep.subr.bf16.mxu0 %v4400_v48  ;;  %v4484_v45 = vld [vmem:[%s6438_s2 + $0x20c] ss:$16 sps:$4 sm:$0xff]  }
  0x65   :  { %1434 = vmatprep.subr.bf16.mxu1 %v4397_v47  ;;  %v4482_v47 = vld [vmem:[%s6438_s2 + $0x208] ss:$16 sps:$4 sm:$0xff]   ;;  %v4487_v48 = vld [vmem:[%s6438_s2 + $0x42c] ss:$16 sps:$4 sm:$0xff]  }
  0x67   :  { %1357 = vmatpush2.bf16.msra.mxu0 %v4398_v50  ;;  %v4485_v50 = vld [vmem:[%s6438_s2 + $0x428] ss:$16 sps:$4 sm:$0xff]  }
  0x68   :  { %1435 = vmatpush1.bf16.msra.mxu1 %v4395_v49  ;;  %1358 = vmatprep.subr.bf16.mxu0 %v4406_v53  ;;  %v4490_v49 = vld [vmem:[%s6438_s2 + $0x3ec] ss:$16 sps:$4 sm:$0xff]  }
  0x69   :  { %1436 = vmatprep.subr.bf16.mxu1 %v4403_v51  ;;  %v4488_v51 = vld [vmem:[%s6438_s2 + $0x3e8] ss:$16 sps:$4 sm:$0xff]   ;;  %v4493_v53 = vld [vmem:[%s6438_s2 + $0x40c] ss:$16 sps:$4 sm:$0xff]  }
  0x6b   :  { %1359 = vmatpush2.bf16.msra.mxu0 %v4404_v55  ;;  %v4491_v55 = vld [vmem:[%s6438_s2 + $0x408] ss:$16 sps:$4 sm:$0xff]  }
  0x6c   :  { %1437 = vmatpush2.bf16.msra.mxu1 %v4401_v54  ;;  %1360 = vmatprep.subr.bf16.mxu0 %v4412_v57  ;;  %v4496_v54 = vld [vmem:[%s6438_s2 + $0x3cc] ss:$16 sps:$4 sm:$0xff]  }
  0x6d   :  { %1438 = vmatprep.subr.bf16.mxu1 %v4409_v56  ;;  %v4494_v56 = vld [vmem:[%s6438_s2 + $0x3c8] ss:$16 sps:$4 sm:$0xff]   ;;  %v4499_v57 = vld [vmem:[%s6438_s2 + $0x5ec] ss:$16 sps:$4 sm:$0xff]  }
  0x6f   :  { %1361 = vmatpush2.bf16.msra.mxu0 %v4410_v59  ;;  %v4497_v59 = vld [vmem:[%s6438_s2 + $0x5e8] ss:$16 sps:$4 sm:$0xff]  }
  0x70   :  { %1439 = vmatpush2.bf16.msra.mxu1 %v4407_v58  ;;  %1362 = vmatprep.subr.bf16.mxu0 %v4418_v61  ;;  %v4502_v58 = vld [vmem:[%s6438_s2 + $0x3ac] ss:$16 sps:$4 sm:$0xff]  }
  0x71   :  { %1440 = vmatprep.subr.bf16.mxu1 %v4415_v60  ;;  %v4500_v60 = vld [vmem:[%s6438_s2 + $0x3a8] ss:$16 sps:$4 sm:$0xff]   ;;  %v4505_v61 = vld [vmem:[%s6438_s2 + $0x5cc] ss:$16 sps:$4 sm:$0xff]  }
  0x73   :  { %1363 = vmatpush2.bf16.msra.mxu0 %v4416_v63  ;;  %v4503_v63 = vld [vmem:[%s6438_s2 + $0x5c8] ss:$16 sps:$4 sm:$0xff]  }
  0x74   :  { %1441 = vmatpush2.bf16.msra.mxu1 %v4413_v62  ;;  %1364 = vmatprep.subr.bf16.mxu0 %v4424_v1  ;;  %v4508_v62 = vld [vmem:[%s6438_s2 + $0x38c] ss:$16 sps:$4 sm:$0xff]  }
  0x75   :  { %1442 = vmatprep.subr.bf16.mxu1 %v4421_v0  ;;  %v4506_v0 = vld [vmem:[%s6438_s2 + $0x388] ss:$16 sps:$4 sm:$0xff]   ;;  %v4511_v1 = vld [vmem:[%s6438_s2 + $0x5ac] ss:$16 sps:$4 sm:$0xff]  }
  0x77   :  { %1365 = vmatpush2.bf16.msra.mxu0 %v4422_v3  ;;  %v4509_v3 = vld [vmem:[%s6438_s2 + $0x5a8] ss:$16 sps:$4 sm:$0xff]  }
  0x78   :  { %1443 = vmatpush2.bf16.msra.mxu1 %v4419_v2  ;;  %1366 = vmatprep.subr.bf16.mxu0 %v4430_v5  ;;  %v4514_v2 = vld [vmem:[%s6438_s2 + $0x36c] ss:$16 sps:$4 sm:$0xff]  }
  0x79   :  { %1444 = vmatprep.subr.bf16.mxu1 %v4427_v4  ;;  %v4512_v4 = vld [vmem:[%s6438_s2 + $0x368] ss:$16 sps:$4 sm:$0xff]   ;;  %v4517_v5 = vld [vmem:[%s6438_s2 + $0x58c] ss:$16 sps:$4 sm:$0xff]  }
  0x7b   :  { %1367 = vmatpush2.bf16.msra.mxu0 %v4428_v7  ;;  %v4515_v7 = vld [vmem:[%s6438_s2 + $0x588] ss:$16 sps:$4 sm:$0xff]  }
  0x7c   :  { %1445 = vmatpush2.bf16.msra.mxu1 %v4425_v6  ;;  %1368 = vmatprep.subr.bf16.mxu0 %v4436_v11  ;;  %v4520_v6 = vld [vmem:[%s6438_s2 + $0x34c] ss:$16 sps:$4 sm:$0xff]  }
  0x7d   :  { %1446 = vmatprep.subr.bf16.mxu1 %v4433_v10  ;;  %v4518_v10 = vld [vmem:[%s6438_s2 + $0x348] ss:$16 sps:$4 sm:$0xff]   ;;  %v4523_v11 = vld [vmem:[%s6438_s2 + $0x56c] ss:$16 sps:$4 sm:$0xff]  }
  0x7f   :  { %1369 = vmatpush2.bf16.msra.mxu0 %v4434_v13  ;;  %v4521_v13 = vld [vmem:[%s6438_s2 + $0x568] ss:$16 sps:$4 sm:$0xff]  }
  0x80   :  { %1447 = vmatpush2.bf16.msra.mxu1 %v4431_v12  ;;  %1461 = vmatprep.subr.bf16.mxu0 %v4442_v17  ;;  %v4526_v12 = vld [vmem:[%s6438_s2 + $0x32c] ss:$16 sps:$4 sm:$0xff]  }
  0x81   :  { %1448 = vmatprep.subr.bf16.mxu1 %v4439_v14  ;;  %v4524_v14 = vld [vmem:[%s6438_s2 + $0x328] ss:$16 sps:$4 sm:$0xff]   ;;  %v4532_v17 = vld [vmem:[%s6438_s2 + $0x30c] ss:$16 sps:$4 sm:$0xff]  }
  0x82   :  { %1371 = vmatmul.mubr.bf16.vlgmr.msra.gmra.mxu0 %v5418_v20 }
  0x83   :  { %1462 = vmatpush1.bf16.msra.mxu0 %v4440_v21  ;;  %1493 = vmatprep.mubr.bf16.mxu0 %v5144_v52  ;;  %v4458_v52 = vld [vmem:[%s6438_s2 + $0x288] ss:$16 sps:$4 sm:$0xff]  }
  0x84   :  { %1449 = vmatpush2.bf16.msra.mxu1 %v4437_v18  ;;  %1463 = vmatprep.subr.bf16.mxu0 %v4448_v23  ;;  %v4527_v18 = vld [vmem:[%s6438_s2 + $0x548] ss:$16 sps:$4 sm:$0xff]  }
  0x85   :  { %1450 = vmatprep.subr.bf16.mxu1 %v4445_v22  ;;  %v4530_v21 = vld [vmem:[%s6438_s2 + $0x308] ss:$16 sps:$4 sm:$0xff]   ;;  %v4535_v22 = vld [vmem:[%s6438_s2 + $0x52c] ss:$16 sps:$4 sm:$0xff]  }
  0x86   :  { %v4542_v23 = vld [vmem:[%s6440_s4 + $0x78] sm:$0xff]  }
  0x87   :  { %1464 = vmatpush1.bf16.msra.mxu0 %v4446_v25  ;;  %v4543_v25 = vld [vmem:[%s6440_s4 + $0x38] sm:$0xff]  }
  0x88   :  { %1451 = vmatpush2.bf16.msra.mxu1 %v4443_v24  ;;  %1465 = vmatprep.subr.bf16.mxu0 %v4454_v27  ;;  %v4533_v24 = vld [vmem:[%s6438_s2 + $0x528] ss:$16 sps:$4 sm:$0xff]   ;;  %v4544_v27 = vld [vmem:[%s6440_s4 + $0x70] sm:$0xff]  }
  0x89   :  { %1502 = vmatprep.subr.bf16.mxu1 %v4451_v26  ;;  %v4538_v26 = vld [vmem:[%s6438_s2 + $0x50c] ss:$16 sps:$4 sm:$0xff]  }
  0x8b   :  { %1453 = vmatmul.mubr.bf16.vlgmr.msra.gmra.mxu1 %v5205_v8  ;;  %1466 = vmatpush1.bf16.msra.mxu0 %v4452_v29  ;;  %v4464_v8 = vld [vmem:[%s6438_s2 + $0x268] ss:$16 sps:$4 sm:$0xff]   ;;  %v4545_v29 = vld [vmem:[%s6440_s4 + $0x30] sm:$0xff]  }
  0x8c   :  { %1503 = vmatpush1.bf16.msra.mxu1 %v4449_v28  ;;  %1467 = vmatprep.subr.bf16.mxu0 %v4460_v31  ;;  %v4536_v28 = vld [vmem:[%s6438_s2 + $0x508] ss:$16 sps:$4 sm:$0xff]  }
  0x8d   :  { %1504 = vmatprep.subr.bf16.mxu1 %v4457_v30  ;;  %1534 = vmatprep.mubr.bf16.mxu1 %v5289_v36  ;;  %v4470_v36 = vld [vmem:[%s6438_s2 + $0x248] ss:$16 sps:$4 sm:$0xff]   ;;  %v4541_v30 = vld [vmem:[%s6438_s2 + $0x60c] ss:$16 sps:$4 sm:$0xff]  }
  0x8e   :  { %v4546_v31 = vld [vmem:[%s6440_s4 + $0x68] sm:$0xff]  }
  0x8f   :  { %1468 = vmatpush1.bf16.msra.mxu0 %v4458_v52  ;;  %v4548_v52 = vld [vmem:[%s6440_s4 + $0x60] sm:$0xff]  }
  0x90   :  { %1505 = vmatpush1.bf16.msra.mxu1 %v4455_v32  ;;  %1469 = vmatprep.subr.bf16.mxu0 %v4466_v34  ;;  %v4539_v32 = vld [vmem:[%s6438_s2 + $0x608] ss:$16 sps:$4 sm:$0xff]  }
  0x91   :  { %1506 = vmatprep.subr.bf16.mxu1 %v4463_v33  ;;  %v4549_v33 = vld [vmem:[%s6440_s4 + $0x20] sm:$0xff]   ;;  %v4550_v34 = vld [vmem:[%s6440_s4 + $0x58] sm:$0xff]  }
  0x93   :  { %1470 = vmatpush1.bf16.msra.mxu0 %v4464_v8  ;;  %v4558_v8 = vld [vmem:[%s6440_s4 + $0xb8] sm:$0xff]  }
  0x94   :  { %1507 = vmatpush1.bf16.msra.mxu1 %v4461_v35  ;;  %1471 = vmatprep.subr.bf16.mxu0 %v4472_v38  ;;  %v4552_v35 = vld [vmem:[%s6440_s4 + $0x50] sm:$0xff]  }
  0x95   :  { %1508 = vmatprep.subr.bf16.mxu1 %v4469_v37  ;;  %v4559_v37 = vld [vmem:[%s6440_s4 + $0xb0] sm:$0xff]  }
  0x96   :  { %v4553_v38 = vld [vmem:[%s6440_s4 + $0x10] sm:$0xff]  }
  0x97   :  { %1472 = vmatpush1.bf16.msra.mxu0 %v4470_v36  ;;  %v4560_v36 = vld [vmem:[%s6440_s4 + $0xa8] sm:$0xff]  }
  0x98   :  { %1509 = vmatpush1.bf16.msra.mxu1 %v4467_v39  ;;  %1473 = vmatprep.subr.bf16.mxu0 %v4478_v41  ;;  %v4554_v39 = vld [vmem:[%s6440_s4 + $0x48] sm:$0xff]   ;;  %v4557_v41 = vld [vmem:[%s6440_s4] sm:$0xff]  }
  0x99   :  { %1510 = vmatprep.subr.bf16.mxu1 %v4475_v40  ;;  %v4556_v40 = vld [vmem:[%s6440_s4 + $0x40] sm:$0xff]  }
  0x9b   :  { %1474 = vmatpush1.bf16.msra.mxu0 %v4476_v43 }
  0x9c   :  { %1511 = vmatpush1.bf16.msra.mxu1 %v4473_v42  ;;  %1475 = vmatprep.subr.bf16.mxu0 %v4484_v45 }
  0x9d   :  { %1512 = vmatprep.subr.bf16.mxu1 %v4481_v44 }
  0x9f   :  { %1476 = vmatpush1.bf16.msra.mxu0 %v4482_v47 }
  0xa0   :  { %1513 = vmatpush1.bf16.msra.mxu1 %v4479_v46  ;;  %1477 = vmatprep.subr.bf16.mxu0 %v4490_v49 }
  0xa1   :  { %1514 = vmatprep.subr.bf16.mxu1 %v4487_v48 }
  0xa3   :  { %1478 = vmatpush2.bf16.msra.mxu0 %v4488_v51 }
  0xa4   :  { %1515 = vmatpush1.bf16.msra.mxu1 %v4485_v50  ;;  %1479 = vmatprep.subr.bf16.mxu0 %v4496_v54 }
  0xa5   :  { %1516 = vmatprep.subr.bf16.mxu1 %v4493_v53 }
  0xa7   :  { %1480 = vmatpush2.bf16.msra.mxu0 %v4494_v56 }
  0xa8   :  { %1517 = vmatpush1.bf16.msra.mxu1 %v4491_v55  ;;  %1481 = vmatprep.subr.bf16.mxu0 %v4502_v58 }
  0xa9   :  { %1518 = vmatprep.subr.bf16.mxu1 %v4499_v57 }
  0xab   :  { %1482 = vmatpush2.bf16.msra.mxu0 %v4500_v60 }
  0xac   :  { %1519 = vmatpush2.bf16.msra.mxu1 %v4497_v59  ;;  %1483 = vmatprep.subr.bf16.mxu0 %v4508_v62 }
  0xad   :  { %1520 = vmatprep.subr.bf16.mxu1 %v4505_v61 }
  0xaf   :  { %1484 = vmatpush2.bf16.msra.mxu0 %v4506_v0 }
  0xb0   :  { %1521 = vmatpush2.bf16.msra.mxu1 %v4503_v63  ;;  %1485 = vmatprep.subr.bf16.mxu0 %v4514_v2 }
  0xb1   :  { %1522 = vmatprep.subr.bf16.mxu1 %v4511_v1 }
  0xb3   :  { %1486 = vmatpush2.bf16.msra.mxu0 %v4512_v4 }
  0xb4   :  { %1523 = vmatpush2.bf16.msra.mxu1 %v4509_v3  ;;  %1487 = vmatprep.subr.bf16.mxu0 %v4520_v6 }
  0xb5   :  { %1524 = vmatprep.subr.bf16.mxu1 %v4517_v5 }
  0xb7   :  { %1488 = vmatpush2.bf16.msra.mxu0 %v4518_v10 }
  0xb8   :  { %1525 = vmatpush2.bf16.msra.mxu1 %v4515_v7  ;;  %1489 = vmatprep.subr.bf16.mxu0 %v4526_v12 }
  0xb9   :  { %1526 = vmatprep.subr.bf16.mxu1 %v4523_v11 }
  0xbb   :  { %1490 = vmatpush2.bf16.msra.mxu0 %v4524_v14 }
  0xbc   :  { %1527 = vmatpush2.bf16.msra.mxu1 %v4521_v13  ;;  %1491 = vmatprep.subr.bf16.mxu0 %v4532_v17 }
  0xbd   :  { %1528 = vmatprep.subr.bf16.mxu1 %v4529_v15 }
  0xbf   :  { %1492 = vmatpush2.bf16.msra.mxu0 %v4530_v21 }
  0xc0   :  { %1529 = vmatpush2.bf16.msra.mxu1 %v4527_v18  ;;  %4200 = vmatprep.subr.bf16.mxu0 %v4542_v23 }
  0xc1   :  { %1530 = vmatprep.subr.bf16.mxu1 %v4535_v22 }
  0xc2   :  { %1494 = vmatmul.mubr.bf16.vlgmr.msra.gmra.mxu0 %v5207_v9  ;;  %v4547_v9 = vld [vmem:[%s6440_s4 + $0x28] sm:$0xff]  }
  0xc3   :  { %4201 = vmatpush3.bf16.msra.mxu0 %v4543_v25 }
  0xc4   :  { %1531 = vmatpush2.bf16.msra.mxu1 %v4533_v24  ;;  %4202 = vmatprep.subr.bf16.mxu0 %v4544_v27 }
  0xc5   :  { %1532 = vmatprep.subr.bf16.mxu1 %v4538_v26 }
  0xc7   :  { %4203 = vmatpush3.bf16.msra.mxu0 %v4545_v29 }
  0xc8   :  { %1533 = vmatpush2.bf16.msra.mxu1 %v4536_v28  ;;  %4204 = vmatprep.subr.bf16.mxu0 %v4546_v31 }
  0xc9   :  { %1557 = vmatprep.subr.bf16.mxu1 %v4541_v30 }
  0xcb   :  { %1535 = vmatmul.mubr.bf16.vlgmr.msra.gmra.mxu1 %v5418_v20  ;;  %4205 = vmatpush3.bf16.msra.mxu0 %v4547_v9  ;;  %v4551_v20 = vld [vmem:[%s6440_s4 + $0x18] sm:$0xff]  }
  0xcc   :  { %1558 = vmatpush1.bf16.msra.mxu1 %v4539_v32  ;;  %1575 = vmatprep.mubr.bf16.mxu1 %v4925_v16 }
  0xcd   :  { %1842 = vmatprep.subr.bf16.mxu1 %v4925_v16  ;;  %4206 = vmatprep.subr.bf16.mxu0 %v4548_v52 }
  0xcf   :  { %4207 = vmatpush3.bf16.msra.mxu0 %v4549_v33 }
  0xd0   :  { %4208 = vmatprep.subr.bf16.mxu0 %v4550_v34 }
  0xd3   :  { %3953 = vmatmul.mubr.msk.bf16.vlgmr.msra.gmra.mxu1 %vm1252_vm0, %v5236_v19  ;;  %4209 = vmatpush3.bf16.msra.mxu0 %v4551_v20  ;;  %v4555_v19 = vld [vmem:[%s6440_s4 + $0x8] sm:$0xff]  }
  0xd4   :  { %1843 = vmatpush1.bf16.msra.mxu1 %v4558_v8  ;;  %4210 = vmatprep.subr.bf16.mxu0 %v4552_v35 }
  0xd5   :  { %1844 = vmatprep.subr.bf16.mxu1 %v4925_v16 }
  0xd7   :  { %4211 = vmatpush3.bf16.msra.mxu0 %v4553_v38 }
  0xd8   :  { %1845 = vmatpush1.bf16.msra.mxu1 %v4559_v37  ;;  %4212 = vmatprep.subr.bf16.mxu0 %v4554_v39 }
  0xd9   :  { %1846 = vmatprep.subr.bf16.mxu1 %v4925_v16 }
  0xdb   :  { %4213 = vmatpush3.bf16.msra.mxu0 %v4555_v19 }
  0xdc   :  { %1847 = vmatpush1.bf16.msra.mxu1 %v4560_v36  ;;  %4214 = vmatprep.subr.bf16.mxu0 %v4556_v40 }
  0xdd   :  { %1848 = vmatprep.subr.bf16.mxu1 %v4925_v16 }
  0xdf   :  { %4215 = vmatpush3.bf16.msra.mxu0 %v4557_v41 }
  0xe0   :  { %18 = vsyncpa [#allocation5], 0  ;;  %v4561_v44 = vld [vmem:[%s6440_s4 + $0xa0] sm:$0xff]   ;;  %v4562_v47 = vld [vmem:[%s6440_s4 + $0x98] sm:$0xff]   ;;  %v252_v61 = vlaneseq  ;;  %s4926_s12 = smov 64  }
  0xe1   :  { %1849 = vmatpush1.bf16.msra.mxu1 %v4561_v44  ;;  %v4563_v54 = vld [vmem:[%s6440_s4 + $0x90] sm:$0xff]   ;;  %v4564_v57 = vld [vmem:[%s6440_s4 + $0x88] sm:$0xff]   ;;  %v4565_v59 = vld [vmem:[%s6440_s4 + $0x80] sm:$0xff]  }
  0xe2   :  { %1850 = vmatprep.subr.bf16.mxu1 %v4925_v16  ;;  %v4566_v60 = vld [vmem:[%s6440_s4 + $0xc0] sm:$0xff]   ;;  %v5715_v62 = vshrl.u32 %v252_v61, 7 }
  0xe3   :  { %v250_v0 = vld [vmem:[%s6439_s3] sm:$0xf] }
  0xe4   :  { %v5718_v63 = vsub.s32 0, %v5715_v62  ;;  %v5724_v1 = vsub.s32 1, %v5715_v62  ;;  %v5730_v31 = vsub.s32 2, %v5715_v62  ;;  %v5733_v9 = vsub.s32 3, %v5715_v62 }
  0xe5   :  { %1851 = vmatpush1.bf16.msra.mxu1 %v4562_v47 }
  0xe6   :  { %1852 = vmatprep.subr.bf16.mxu1 %v4925_v16  ;;  %v255_v2 = vrot.slane %v250_v0, %v5718_v63  ;;  %v259_v3 = vrot.slane %v250_v0, %v5724_v1  ;;  %v263_v33 = vrot.slane %v250_v0, %v5730_v31  ;;  %v267_v20 = vrot.slane %v250_v0, %v5733_v9 }
  0xe9   :  { %1853 = vmatpush1.bf16.msra.mxu1 %v4563_v54  ;;  %v4569_v54 = vld [vmem:[%s6442_s6 + $0xe4] ss:$16 sps:$4 sm:$0xff]  }
  0xea   :  { %1854 = vmatprep.subr.bf16.mxu1 %v4925_v16  ;;  %2110 = vmatprep.subr.bf16.mxu0 %v4569_v54  ;;  %v4647_v54 = vld [vmem:[%s6444_s8 + $0x4d4] ss:$28 sps:$4 sm:$0xff]  }
  0xed   :  { %1855 = vmatpush1.bf16.msra.mxu1 %v4564_v57  ;;  %v4575_v57 = vld [vmem:[%s6442_s6 + $0xc4] ss:$16 sps:$4 sm:$0xff]  }
  0xee   :  { %1856 = vmatprep.subr.bf16.mxu1 %v4925_v16 }
  0xf1   :  { %1857 = vmatpush1.bf16.msra.mxu1 %v4565_v59  ;;  %v4573_v59 = vld [vmem:[%s6442_s6 + $0xc0] ss:$16 sps:$4 sm:$0xff]  }
  0xf2   :  { %1872 = vmatprep.subr.bf16.mxu1 %v4925_v16 }
  0xf5   :  { %1873 = vmatpush2.bf16.msra.mxu1 %v4566_v60  ;;  %v4576_v60 = vld [vmem:[%s6442_s6 + $0xc8] ss:$16 sps:$4 sm:$0xff]  }
 0x102   :  { %v1290_v42 = vpop.f32.mrf.mxu0 }
 0x103   :  { %v1331_v43 = vpop.f32.mrf.mxu1  ;;  %v1291_v4 = vadd.f32 %v1290_v42, %v255_v2 }
 0x104   :  { %v1292_v45 = vpop.f32.mrf.mxu0 }
 0x105   :  { %v1333_v46 = vpop.f32.mrf.mxu1  ;;  %v1293_v5 = vadd.f32 %v1292_v45, %v259_v3  ;;  %v1332_v6 = vadd.f32 %v1331_v43, %v1291_v4 }
 0x106   :  { %v1294_v49 = vpop.f32.mrf.mxu0 }
 0x107   :  { %v1335_v48 = vpop.f32.mrf.mxu1  ;;  %v1334_v10 = vadd.f32 %v1333_v46, %v1293_v5 }
 0x108   :  { %v1295_v51 = vpop.f32.mrf.mxu0 }
 0x109   :  { %v1336_v50 = vpop.f32.mrf.mxu1 }
 0x10b   :  { %v1413_v53 = vpop.f32.mrf.mxu1 }
 0x10d   :  { %v1415_v55 = vpop.f32.mrf.mxu1 }
 0x10f   :  { %v1417_v56 = vpop.f32.mrf.mxu1 }
 0x110   :  { %v4572_v56 = vld [vmem:[%s6442_s6 + $0xec] ss:$16 sps:$4 sm:$0xff]  }
 0x111   :  { %v1418_v58 = vpop.f32.mrf.mxu1  ;;  %2151 = vmatprep.subr.bf16.mxu1 %v4572_v56  ;;  %v4645_v56 = vld [vmem:[%s6444_s8 + $0x4d0] ss:$28 sps:$4 sm:$0xff]  }
 0x112   :  { %v4578_v58 = vld [vmem:[%s6442_s6 + $0xcc] ss:$16 sps:$4 sm:$0xff]  }
 0x142   :  { %v1372_v7 = vpop.f32.mrf.mxu0 }
 0x143   :  { %v1373_v11 = vadd.f32 %v1372_v7, %v1332_v6  ;;  %v4581_v6 = vld [vmem:[%s6442_s6 + $0xa4] ss:$16 sps:$4 sm:$0xff]   ;;  %v4584_v7 = vld [vmem:[%s6442_s6 + $0xac] ss:$16 sps:$4 sm:$0xff]  }
 0x144   :  { %v1374_v12 = vpop.f32.mrf.mxu0 }
 0x145   :  { %v1414_v13 = vadd.f32 %v1413_v53, %v1373_v11  ;;  %v1375_v14 = vadd.f32 %v1374_v12, %v1334_v10  ;;  %v4567_v53 = vld [vmem:[%s6442_s6 + $0xe0] ss:$16 sps:$4 sm:$0xff]   ;;  %v4582_v11 = vld [vmem:[%s6442_s6 + $0xa8] ss:$16 sps:$4 sm:$0xff]   ;;  %v4587_v12 = vld [vmem:[%s6442_s6 + $0x84] ss:$16 sps:$4 sm:$0xff]  }
 0x146   :  { %v1376_v15 = vpop.f32.mrf.mxu0  ;;  %v4579_v10 = vld [vmem:[%s6442_s6 + $0xa0] ss:$16 sps:$4 sm:$0xff]  }
 0x147   :  { %v1416_v17 = vadd.f32 %v1415_v55, %v1375_v14  ;;  %v1584_v18 = vmax.f32 %v1414_v13, 0.0  ;;  %v4570_v55 = vld [vmem:[%s6442_s6 + $0xe8] ss:$16 sps:$4 sm:$0xff]   ;;  %v4590_v13 = vld [vmem:[%s6442_s6 + $0x8c] ss:$16 sps:$4 sm:$0xff]  }
 0x148   :  { %v1377_v21 = vpop.f32.mrf.mxu0  ;;  %v4585_v14 = vld [vmem:[%s6442_s6 + $0x80] ss:$16 sps:$4 sm:$0xff]   ;;  %v4588_v15 = vld [vmem:[%s6442_s6 + $0x88] ss:$16 sps:$4 sm:$0xff]  }
 0x149   :  { %v1585_v22 = vmax.f32 %v1416_v17, 0.0  ;;  %v1588_v25 = vpack.c.bf16 %v1584_v18, %v1584_v18  ;;  %v3954_v17 = vld [vmem:[%s6441_s5] ss:$0 sm:$0xff]  ;;  %v4593_v18 = vld [vmem:[%s6442_s6 + $0x64] ss:$16 sps:$4 sm:$0xff]  }
 0x14a   :  { %v4591_v21 = vld [vmem:[%s6442_s6 + $0x60] ss:$16 sps:$4 sm:$0xff]  }
 0x14b   :  { %v1454_v23 = vpop.f32.mrf.mxu1  ;;  %v1589_v24 = vpack.c.bf16 %v1585_v22, %v1585_v22  ;;  %v4594_v22 = vld [vmem:[%s6442_s6 + $0x68] ss:$16 sps:$4 sm:$0xff]  }
 0x14c   :  { %v1455_v8 = vadd.f32 %v1454_v23, %v263_v33  ;;  %v4596_v23 = vld [vmem:[%s6442_s6 + $0x6c] ss:$16 sps:$4 sm:$0xff]  }
 0x14d   :  { %v1456_v26 = vpop.f32.mrf.mxu1  ;;  %1834 = vmatprep.mubr.bf16.mxu0 %v1589_v24  ;;  %v4599_v24 = vld [vmem:[%s6442_s6 + $0x44] ss:$16 sps:$4 sm:$0xff]  }
 0x14e   :  { %1835 = vmatmul.mubr.bf16.vlgmr.msra.gmra.mxu0 %v1588_v25  ;;  %v1457_v38 = vadd.f32 %v1456_v26, %v267_v20  ;;  %v4602_v25 = vld [vmem:[%s6442_s6 + $0x4c] ss:$16 sps:$4 sm:$0xff]   ;;  %v4603_v20 = vld [vmem:[%s6442_s6 + $0x20] ss:$16 sps:$4 sm:$0xff]  }
 0x14f   :  { %v1458_v27 = vpop.f32.mrf.mxu1  ;;  %2142 = vmatprep.mubr.bf16.mxu0 %v4925_v16  ;;  %2111 = vmatpush1.bf16.msra.mxu0 %v4567_v53  ;;  %v4620_v53 = vld [vmem:[%s6444_s8 + $0x154] ss:$28 sps:$4 sm:$0xff]  }
 0x150   :  { %2112 = vmatprep.subr.bf16.mxu0 %v4575_v57  ;;  %v4623_v57 = vld [vmem:[%s6444_s8 + $0x11c] ss:$28 sps:$4 sm:$0xff]  }
 0x151   :  { %v1459_v28 = vpop.f32.mrf.mxu1 }
 0x152   :  { %v4597_v28 = vld [vmem:[%s6442_s6 + $0x40] ss:$16 sps:$4 sm:$0xff]  }
 0x153   :  { %2113 = vmatpush1.bf16.msra.mxu0 %v4573_v59  ;;  %v4621_v59 = vld [vmem:[%s6444_s8 + $0x118] ss:$28 sps:$4 sm:$0xff]  }
 0x154   :  { %2114 = vmatprep.subr.bf16.mxu0 %v4581_v6  ;;  %v4665_v6 = vld [vmem:[%s6444_s8 + $0x42c] ss:$28 sps:$4 sm:$0xff]  }
 0x157   :  { %2115 = vmatpush1.bf16.msra.mxu0 %v4579_v10  ;;  %v4663_v10 = vld [vmem:[%s6444_s8 + $0x428] ss:$28 sps:$4 sm:$0xff]  }
 0x158   :  { %2116 = vmatprep.subr.bf16.mxu0 %v4587_v12  ;;  %v4671_v12 = vld [vmem:[%s6444_s8 + $0x3f4] ss:$28 sps:$4 sm:$0xff]  }
 0x15b   :  { %2117 = vmatpush1.bf16.msra.mxu0 %v4585_v14  ;;  %v4669_v14 = vld [vmem:[%s6444_s8 + $0x3f0] ss:$28 sps:$4 sm:$0xff]  }
 0x15c   :  { %2118 = vmatprep.subr.bf16.mxu0 %v4593_v18  ;;  %v4633_v18 = vld [vmem:[%s6444_s8 + $0x38] ss:$28 sps:$4 sm:$0xff]  }
 0x15f   :  { %2119 = vmatpush1.bf16.msra.mxu0 %v4591_v21  ;;  %v4675_v21 = vld [vmem:[%s6444_s8 + $0x3b8] ss:$28 sps:$4 sm:$0xff]  }
 0x160   :  { %2120 = vmatprep.subr.bf16.mxu0 %v4599_v24  ;;  %v4644_v24 = vld [vmem:[%s6444_s8 + $0x34c] ss:$28 sps:$4 sm:$0xff]  }
 0x163   :  { %2121 = vmatpush1.bf16.msra.mxu0 %v4597_v28  ;;  %v4656_v28 = vld [vmem:[%s6444_s8 + $0x2dc] ss:$28 sps:$4 sm:$0xff]  }
 0x182   :  { %v1495_v29 = vpop.f32.mrf.mxu0 }
 0x183   :  { %v1496_v39 = vadd.f32 %v1495_v29, %v1455_v8  ;;  %v4600_v29 = vld [vmem:[%s6442_s6 + $0x48] ss:$16 sps:$4 sm:$0xff]   ;;  %v4611_v8 = vld [vmem:[%s6442_s6 + $0x4] ss:$16 sps:$4 sm:$0xff]  }
 0x184   :  { %v1497_v30 = vpop.f32.mrf.mxu0 }
 0x185   :  { %v1498_v19 = vadd.f32 %v1497_v30, %v1457_v38 }
 0x186   :  { %v1499_v32 = vpop.f32.mrf.mxu0 }
 0x187   :  { %v4605_v32 = vld [vmem:[%s6442_s6 + $0x24] ss:$16 sps:$4 sm:$0xff]  }
 0x188   :  { %v1500_v52 = vpop.f32.mrf.mxu0  ;;  %2122 = vmatprep.subr.bf16.mxu0 %v4605_v32  ;;  %v4660_v32 = vld [vmem:[%s6444_s8 + $0x2a0] ss:$28 sps:$4 sm:$0xff]  }
 0x189   :  { %v4608_v52 = vld [vmem:[%s6442_s6 + $0x2c] ss:$16 sps:$4 sm:$0xff]   ;;  %2123 = vmatpush1.bf16.msra.mxu0 %v4603_v20 }
 0x18a   :  { %2124 = vmatprep.subr.bf16.mxu0 %v4611_v8  ;;  %v4672_v20 = vld [vmem:[%s6444_s8 + $0x230] ss:$28 sps:$4 sm:$0xff]   ;;  %v4683_v8 = vld [vmem:[%s6444_s8 + $0x384] ss:$28 sps:$4 sm:$0xff]  }
 0x18b   :  { %v1536_v34 = vpop.f32.mrf.mxu1 }
 0x18c   :  { %v1537_v40 = vadd.f32 %v1536_v34, %v1496_v39  ;;  %v4609_v39 = vld [vmem:[%s6442_s6] ss:$16 sps:$4 sm:$0xff]  }
 0x18d   :  { %v1538_v35 = vpop.f32.mrf.mxu1  ;;  %2125 = vmatpush1.bf16.msra.mxu0 %v4609_v39  ;;  %v4686_v39 = vld [vmem:[%s6444_s8 + $0x1c4] ss:$28 sps:$4 sm:$0xff]  }
 0x18e   :  { %v1539_v42 = vadd.f32 %v1538_v35, %v1498_v19  ;;  %v4606_v35 = vld [vmem:[%s6442_s6 + $0x28] ss:$16 sps:$4 sm:$0xff]  }
 0x18f   :  { %v1540_v37 = vpop.f32.mrf.mxu1  ;;  %v4617_v19 = vld [vmem:[%s6444_s8 + $0x18c] ss:$28 sps:$4 sm:$0xff]  }
 0x190   :  { %v4614_v37 = vld [vmem:[%s6442_s6 + $0xc] ss:$16 sps:$4 sm:$0xff]   ;;  %3340 = vmatprep.subr.bf16.mxu0 %v4617_v19 }
 0x191   :  { %v1541_v36 = vpop.f32.mrf.mxu1  ;;  %v4684_v19 = vld [vmem:[%s6444_s8 + $0x1c0] ss:$28 sps:$4 sm:$0xff]  }
 0x192   :  { %v4612_v36 = vld [vmem:[%s6442_s6 + $0x8] ss:$16 sps:$4 sm:$0xff]  }
 0x193   :  { %v1577_v41 = vpop.f32.mrf.mxu1 }
 0x194   :  { %v1578_v43 = vadd.f32 %v1577_v41, %v1537_v40  ;;  %v4641_v40 = vld [vmem:[%s6444_s8 + $0x50c] ss:$28 sps:$4 sm:$0xff]   ;;  %v1884_v41 = vand.u32 127, %v252_v61 }
 0x195   :  { %v1579_v44 = vpop.f32.mrf.mxu1  ;;  %v4639_v61 = vld [vmem:[%s6444_s8 + $0x508] ss:$28 sps:$4 sm:$0xff]  }
 0x196   :  { %v1580_v45 = vadd.f32 %v1579_v44, %v1539_v42  ;;  %v1586_v46 = vmax.f32 %v1578_v43, 0.0  ;;  %vm1887_vm1 = vcmp.lt.s32.totalorder %v1884_v41, 64  ;;  %v4692_v41 = vld [vmem:[%s6444_s8 + $0x194] ss:$28 sps:$4 sm:$0xff]  }
 0x197   :  { %v1581_v47 = vpop.f32.mrf.mxu1 }
 0x198   :  { %v1587_v48 = vmax.f32 %v1580_v45, 0.0  ;;  %v1590_v51 = vpack.c.bf16 %v1586_v46, %v1586_v46  ;;  %v1892_v46 = vld [vmem:[%s6437_s1] sm:$0xff] }
 0x199   :  { %v1582_v49 = vpop.f32.mrf.mxu1 }
 0x19a   :  { %v1591_v50 = vpack.c.bf16 %v1587_v48, %v1587_v48 }
 0x19c   :  { %3980 = vmatprep.mubr.msk.bf16.mxu1 %vm1252_vm0, %v1591_v50  ;;  %v4615_v50 = vld [vmem:[%s6444_s8 + $0x188] ss:$28 sps:$4 sm:$0xff]  }
 0x19d   :  { %1875 = vmatmul.mubr.bf16.vlgmr.msra.gmra.mxu1 %v1590_v51 }
 0x19e   :  { %2183 = vmatprep.mubr.bf16.mxu1 %v4925_v16  ;;  %2152 = vmatpush1.bf16.msra.mxu1 %v4570_v55  ;;  %v4618_v55 = vld [vmem:[%s6444_s8 + $0x150] ss:$28 sps:$4 sm:$0xff]  }
 0x19f   :  { %2153 = vmatprep.subr.bf16.mxu1 %v4578_v58  ;;  %v4653_v58 = vld [vmem:[%s6444_s8 + $0x49c] ss:$28 sps:$4 sm:$0xff]  }
 0x1a2   :  { %2154 = vmatpush1.bf16.msra.mxu1 %v4576_v60  ;;  %v4651_v60 = vld [vmem:[%s6444_s8 + $0x498] ss:$28 sps:$4 sm:$0xff]  }
 0x1a3   :  { %2155 = vmatprep.subr.bf16.mxu1 %v4584_v7  ;;  %v4627_v7 = vld [vmem:[%s6444_s8 + $0xa8] ss:$28 sps:$4 sm:$0xff]  }
 0x1a6   :  { %2156 = vmatpush1.bf16.msra.mxu1 %v4582_v11  ;;  %v4632_v11 = vld [vmem:[%s6444_s8 + $0x74] ss:$28 sps:$4 sm:$0xff]  }
 0x1a7   :  { %2157 = vmatprep.subr.bf16.mxu1 %v4590_v13  ;;  %v4630_v13 = vld [vmem:[%s6444_s8 + $0x70] ss:$28 sps:$4 sm:$0xff]  }
 0x1aa   :  { %2158 = vmatpush1.bf16.msra.mxu1 %v4588_v15  ;;  %v4635_v15 = vld [vmem:[%s6444_s8 + $0x3c] ss:$28 sps:$4 sm:$0xff]  }
 0x1ab   :  { %2159 = vmatprep.subr.bf16.mxu1 %v4596_v23  ;;  %v4636_v23 = vld [vmem:[%s6444_s8] ss:$28 sps:$4 sm:$0xff]  }
 0x1ae   :  { %2160 = vmatpush1.bf16.msra.mxu1 %v4594_v22  ;;  %v4638_v22 = vld [vmem:[%s6444_s8 + $0x4] ss:$28 sps:$4 sm:$0xff]  }
 0x1af   :  { %2161 = vmatprep.subr.bf16.mxu1 %v4602_v25  ;;  %v4642_v25 = vld [vmem:[%s6444_s8 + $0x348] ss:$28 sps:$4 sm:$0xff]  }
 0x1b2   :  { %2162 = vmatpush1.bf16.msra.mxu1 %v4600_v29  ;;  %v4654_v29 = vld [vmem:[%s6444_s8 + $0x2d8] ss:$28 sps:$4 sm:$0xff]  }
 0x1b3   :  { %2163 = vmatprep.subr.bf16.mxu1 %v4608_v52  ;;  %v4668_v52 = vld [vmem:[%s6444_s8 + $0x26c] ss:$28 sps:$4 sm:$0xff]  }
 0x1b6   :  { %2164 = vmatpush1.bf16.msra.mxu1 %v4606_v35  ;;  %v4680_v35 = vld [vmem:[%s6444_s8 + $0x1fc] ss:$28 sps:$4 sm:$0xff]  }
 0x1b7   :  { %2165 = vmatprep.subr.bf16.mxu1 %v4614_v37  ;;  %v4678_v37 = vld [vmem:[%s6444_s8 + $0x1f8] ss:$28 sps:$4 sm:$0xff]  }
 0x1ba   :  { %2166 = vmatpush1.bf16.msra.mxu1 %v4612_v36  ;;  %v4689_v36 = vld [vmem:[%s6444_s8 + $0x544] ss:$28 sps:$4 sm:$0xff]  }
 0x1bb   :  { %3381 = vmatprep.subr.bf16.mxu1 %v4641_v40  ;;  %v4687_v40 = vld [vmem:[%s6444_s8 + $0x540] ss:$28 sps:$4 sm:$0xff]  }
 0x20e   :  { %v4216_v0 = vpop.f32.mrf.mxu0 }
 0x210   :  { %v4217_v2 = vpop.f32.mrf.mxu0 }
 0x211   :  { %v4218_v3 = vadd.f32 %v4217_v2, %v4216_v0  ;;  %v4626_v0 = vld [vmem:[%s6444_s8 + $0xe4] ss:$28 sps:$4 sm:$0xff]  }
 0x212   :  { %v4219_v4 = vpop.f32.mrf.mxu0  ;;  %v4659_v2 = vld [vmem:[%s6444_s8 + $0x464] ss:$28 sps:$4 sm:$0xff]  }
 0x213   :  { %v1837_v26 = vadd.f32 %v4218_v3, %v3954_v17  ;;  %v4624_v3 = vld [vmem:[%s6444_s8 + $0xe0] ss:$28 sps:$4 sm:$0xff]  }
 0x214   :  { %v4220_v5 = vpop.f32.mrf.mxu0  ;;  %v4657_v4 = vld [vmem:[%s6444_s8 + $0x460] ss:$28 sps:$4 sm:$0xff]  }
 0x215   :  { %v4629_v5 = vld [vmem:[%s6444_s8 + $0xac] ss:$28 sps:$4 sm:$0xff]   ;;  %v4677_v17 = vld [vmem:[%s6444_s8 + $0x3bc] ss:$28 sps:$4 sm:$0xff]  }
 0x25d   :  { %v1876_v27 = vpop.f32.mrf.mxu1 }
 0x25e   :  { %v1877_v30 = vadd.f32 %v1876_v27, %v1837_v26  ;;  %v4650_v26 = vld [vmem:[%s6444_s8 + $0x314] ss:$28 sps:$4 sm:$0xff]  }
 0x25f   :  { %v1878_v33 = vpop.f32.mrf.mxu1  ;;  %v4648_v27 = vld [vmem:[%s6444_s8 + $0x310] ss:$28 sps:$4 sm:$0xff]  }
 0x260   :  { %1882 = vst [vmem:[#allocation4] sm:$0xff] %v1877_v30  ;;  %1885 = vrot.lane.b32.xlu0 %v1877_v30, %s4926_s12  ;;  %v4666_v33 = vld [vmem:[%s6444_s8 + $0x268] ss:$28 sps:$4 sm:$0xff]  }
 0x261   :  { %v1879_v34 = vpop.f32.mrf.mxu1 }
 0x262   :  { %v4674_v34 = vld [vmem:[%s6444_s8 + $0x234] ss:$28 sps:$4 sm:$0xff]  }
 0x263   :  { %v1880_v38 = vpop.f32.mrf.mxu1 }
 0x264   :  { %v4681_v38 = vld [vmem:[%s6444_s8 + $0x380] ss:$28 sps:$4 sm:$0xff]  }
 0x2d2   :  { %v1886_v42 = vpop.permute.xlu0 %1885 }
 0x2d3   :  { %v1888_v43 = vsel %vm1887_vm1, %v1886_v42, 0.0  ;;  %v4695_v42 = vld [vmem:[%s6444_s8 + $0x514] ss:$28 sps:$4 sm:$0xff]  }
 0x2d4   :  { %v1889_v44 = vmul.f32 0.5, %v1888_v43  ;;  %v1928_v43 = vld [vmem:[%s6443_s7] sm:$0xf] }
 0x2d6   :  { %v1890_v45 = vmul.f32 1.442695, %v1889_v44  ;;  %v1933_v44 = vrot.slane %v1928_v43, %v5718_v63 }
 0x2d8   :  { %4865 = vpow2.f32 %v1890_v45  ;;  %v1941_v45 = vrot.slane %v1928_v43, %v5730_v31 }
 0x2e5   :  { %v4866_v47 = vpop.eup %4865 }
 0x2e6   :  { %v1893_v48 = vmul.f32 %v4866_v47, %v1892_v46  ;;  %v1937_v46 = vrot.slane %v1928_v43, %v5724_v1  ;;  %v1945_v47 = vrot.slane %v1928_v43, %v5733_v9  ;;  %v4741_v43 = vld [vmem:[%s6444_s8 + $0x548] ss:$28 sps:$4 sm:$0xff]  }
 0x2e8   :  { %v1894_v49 = vadd.f32 %v1893_v48, %v1877_v30  ;;  %v4662_v30 = vld [vmem:[%s6444_s8 + $0x2a4] ss:$28 sps:$4 sm:$0xff]  }
 0x2ea   :  { %v1895_v51 = vpack.c.bf16 %v1894_v49, %v1894_v49 }
 0x2ec   :  { %2143 = vmatmul.mubr.bf16.vlgmr.msra.gmra.mxu0 %v1895_v51  ;;  %2184 = vmatmul.mubr.bf16.vlgmr.msra.gmra.mxu1 %v1895_v51 }
 0x2ed   :  { %3341 = vmatpush1.bf16.msra.mxu0 %v4615_v50  ;;  %3382 = vmatpush1.bf16.msra.mxu1 %v4639_v61 }
 0x2ee   :  { %3342 = vmatprep.subr.bf16.mxu0 %v4620_v53  ;;  %3383 = vmatprep.subr.bf16.mxu1 %v4647_v54 }
 0x2f1   :  { %3343 = vmatpush1.bf16.msra.mxu0 %v4618_v55  ;;  %3384 = vmatpush1.bf16.msra.mxu1 %v4645_v56 }
 0x2f2   :  { %3344 = vmatprep.subr.bf16.mxu0 %v4623_v57  ;;  %3385 = vmatprep.subr.bf16.mxu1 %v4653_v58 }
 0x2f5   :  { %3345 = vmatpush1.bf16.msra.mxu0 %v4621_v59  ;;  %3386 = vmatpush1.bf16.msra.mxu1 %v4651_v60 }
 0x2f6   :  { %3346 = vmatprep.subr.bf16.mxu0 %v4626_v0  ;;  %3387 = vmatprep.subr.bf16.mxu1 %v4659_v2 }
 0x2f9   :  { %3347 = vmatpush1.bf16.msra.mxu0 %v4624_v3  ;;  %3388 = vmatpush1.bf16.msra.mxu1 %v4657_v4 }
 0x2fa   :  { %3348 = vmatprep.subr.bf16.mxu0 %v4629_v5  ;;  %3389 = vmatprep.subr.bf16.mxu1 %v4665_v6  ;;  %v4690_v6 = vld [vmem:[%s6444_s8 + $0x190] ss:$28 sps:$4 sm:$0xff]  }
 0x2fd   :  { %3349 = vmatpush1.bf16.msra.mxu0 %v4627_v7  ;;  %3390 = vmatpush1.bf16.msra.mxu1 %v4663_v10  ;;  %v4693_v7 = vld [vmem:[%s6444_s8 + $0x510] ss:$28 sps:$4 sm:$0xff]  }
 0x2fe   :  { %3350 = vmatprep.subr.bf16.mxu0 %v4632_v11  ;;  %3391 = vmatprep.subr.bf16.mxu1 %v4671_v12  ;;  %v4698_v12 = vld [vmem:[%s6444_s8 + $0x15c] ss:$28 sps:$4 sm:$0xff]  }
 0x301   :  { %3351 = vmatpush1.bf16.msra.mxu0 %v4630_v13  ;;  %3392 = vmatpush1.bf16.msra.mxu1 %v4669_v14  ;;  %v4701_v13 = vld [vmem:[%s6444_s8 + $0x4dc] ss:$28 sps:$4 sm:$0xff]  }
 0x302   :  { %3352 = vmatprep.subr.bf16.mxu0 %v4635_v15  ;;  %3393 = vmatprep.subr.bf16.mxu1 %v4677_v17  ;;  %v4696_v14 = vld [vmem:[%s6444_s8 + $0x158] ss:$28 sps:$4 sm:$0xff]   ;;  %v4704_v17 = vld [vmem:[%s6444_s8 + $0x124] ss:$28 sps:$4 sm:$0xff]  }
 0x303   :  { %v4699_v15 = vld [vmem:[%s6444_s8 + $0x4d8] ss:$28 sps:$4 sm:$0xff]  }
 0x305   :  { %3353 = vmatpush1.bf16.msra.mxu0 %v4633_v18  ;;  %3394 = vmatpush1.bf16.msra.mxu1 %v4675_v21  ;;  %v4707_v18 = vld [vmem:[%s6444_s8 + $0x4a4] ss:$28 sps:$4 sm:$0xff]  }
 0x306   :  { %3354 = vmatprep.subr.bf16.mxu0 %v4638_v22  ;;  %3395 = vmatprep.subr.bf16.mxu1 %v4683_v8  ;;  %v4702_v21 = vld [vmem:[%s6444_s8 + $0x120] ss:$28 sps:$4 sm:$0xff]  }
 0x307   :  { %v4705_v22 = vld [vmem:[%s6444_s8 + $0x4a0] ss:$28 sps:$4 sm:$0xff]  }
 0x308   :  { %v4726_v8 = vld [vmem:[%s6444_s8 + $0x40] ss:$28 sps:$4 sm:$0xff]  }
 0x309   :  { %3355 = vmatpush1.bf16.msra.mxu0 %v4636_v23  ;;  %3396 = vmatpush1.bf16.msra.mxu1 %v4681_v38  ;;  %v4710_v23 = vld [vmem:[%s6444_s8 + $0xec] ss:$28 sps:$4 sm:$0xff]  }
 0x30a   :  { %3356 = vmatprep.subr.bf16.mxu0 %v4644_v24  ;;  %3411 = vmatprep.subr.bf16.mxu1 %v4689_v36  ;;  %v4713_v24 = vld [vmem:[%s6444_s8 + $0x46c] ss:$28 sps:$4 sm:$0xff]  }
 0x30b   :  { %v4734_v38 = vld [vmem:[%s6444_s8 + $0xc] ss:$28 sps:$4 sm:$0xff]  }
 0x30c   :  { %v4732_v36 = vld [vmem:[%s6444_s8 + $0x8] ss:$28 sps:$4 sm:$0xff]  }
 0x30d   :  { %3357 = vmatpush2.bf16.msra.mxu0 %v4642_v25  ;;  %3412 = vmatpush2.bf16.msra.mxu1 %v4687_v40  ;;  %v4708_v25 = vld [vmem:[%s6444_s8 + $0xe8] ss:$28 sps:$4 sm:$0xff]   ;;  %v4740_v40 = vld [vmem:[%s6444_s8 + $0x354] ss:$28 sps:$4 sm:$0xff]  }
 0x30e   :  { %3358 = vmatprep.subr.bf16.mxu0 %v4650_v26  ;;  %3422 = vmatprep.subr.bf16.mxu1 %v4692_v41  ;;  %v4711_v26 = vld [vmem:[%s6444_s8 + $0x468] ss:$28 sps:$4 sm:$0xff]  }
 0x30f   :  { %v4743_v41 = vld [vmem:[%s6444_s8 + $0x54c] ss:$28 sps:$4 sm:$0xff]  }
 0x311   :  { %3359 = vmatpush2.bf16.msra.mxu0 %v4648_v27  ;;  %v4716_v27 = vld [vmem:[%s6444_s8 + $0xb4] ss:$28 sps:$4 sm:$0xff]  }
 0x312   :  { %3360 = vmatprep.subr.bf16.mxu0 %v4656_v28  ;;  %v4719_v28 = vld [vmem:[%s6444_s8 + $0x434] ss:$28 sps:$4 sm:$0xff]  }
 0x315   :  { %3361 = vmatpush2.bf16.msra.mxu0 %v4654_v29  ;;  %v4714_v29 = vld [vmem:[%s6444_s8 + $0xb0] ss:$28 sps:$4 sm:$0xff]  }
 0x316   :  { %3362 = vmatprep.subr.bf16.mxu0 %v4662_v30  ;;  %v4717_v30 = vld [vmem:[%s6444_s8 + $0x430] ss:$28 sps:$4 sm:$0xff]  }
 0x319   :  { %3363 = vmatpush2.bf16.msra.mxu0 %v4660_v32  ;;  %v4722_v32 = vld [vmem:[%s6444_s8 + $0x7c] ss:$28 sps:$4 sm:$0xff]  }
 0x31a   :  { %3364 = vmatprep.subr.bf16.mxu0 %v4668_v52  ;;  %v4725_v52 = vld [vmem:[%s6444_s8 + $0x3fc] ss:$28 sps:$4 sm:$0xff]  }
 0x31d   :  { %3365 = vmatpush2.bf16.msra.mxu0 %v4666_v33  ;;  %v4720_v33 = vld [vmem:[%s6444_s8 + $0x78] ss:$28 sps:$4 sm:$0xff]  }
 0x31e   :  { %3366 = vmatprep.subr.bf16.mxu0 %v4674_v34  ;;  %v4723_v34 = vld [vmem:[%s6444_s8 + $0x3f8] ss:$28 sps:$4 sm:$0xff]  }
 0x321   :  { %3367 = vmatpush2.bf16.msra.mxu0 %v4672_v20  ;;  %v4728_v20 = vld [vmem:[%s6444_s8 + $0x44] ss:$28 sps:$4 sm:$0xff]  }
 0x322   :  { %3368 = vmatprep.subr.bf16.mxu0 %v4680_v35  ;;  %v4731_v35 = vld [vmem:[%s6444_s8 + $0x3c4] ss:$28 sps:$4 sm:$0xff]  }
 0x325   :  { %3369 = vmatpush2.bf16.msra.mxu0 %v4678_v37  ;;  %v4729_v37 = vld [vmem:[%s6444_s8 + $0x3c0] ss:$28 sps:$4 sm:$0xff]  }
 0x326   :  { %3370 = vmatprep.subr.bf16.mxu0 %v4686_v39  ;;  %v4737_v39 = vld [vmem:[%s6444_s8 + $0x38c] ss:$28 sps:$4 sm:$0xff]  }
 0x329   :  { %3371 = vmatpush2.bf16.msra.mxu0 %v4684_v19  ;;  %v4735_v19 = vld [vmem:[%s6444_s8 + $0x388] ss:$28 sps:$4 sm:$0xff]  }
 0x32a   :  { %3463 = vmatprep.subr.bf16.mxu0 %v4695_v42  ;;  %v4738_v42 = vld [vmem:[%s6444_s8 + $0x350] ss:$28 sps:$4 sm:$0xff]  }
 0x3ac   :  { %v2144_v48 = vpop.f32.mrf.mxu0  ;;  %v2185_v49 = vpop.f32.mrf.mxu1 }
 0x3ad   :  { %v2145_v50 = vadd.f32 %v2144_v48, %v1933_v44  ;;  %v2186_v61 = vadd.f32 %v2185_v49, %v1941_v45  ;;  %v4746_v44 = vld [vmem:[%s6444_s8 + $0x31c] ss:$28 sps:$4 sm:$0xff]   ;;  %v4752_v48 = vld [vmem:[%s6444_s8 + $0x2e4] ss:$28 sps:$4 sm:$0xff]  }
 0x3ae   :  { %v2146_v51 = vpop.f32.mrf.mxu0  ;;  %v2187_v53 = vpop.f32.mrf.mxu1  ;;  %v4749_v45 = vld [vmem:[%s6444_s8 + $0x19c] ss:$28 sps:$4 sm:$0xff]   ;;  %v4755_v49 = vld [vmem:[%s6444_s8 + $0x164] ss:$28 sps:$4 sm:$0xff]  }
 0x3af   :  { %v2147_v54 = vadd.f32 %v2146_v51, %v1937_v46  ;;  %v2188_v55 = vadd.f32 %v2187_v53, %v1945_v47  ;;  %v2192_v56 = vmax.f32 %v2145_v50, 0.0  ;;  %v2194_v57 = vmax.f32 %v2186_v61, 0.0  ;;  %v4744_v46 = vld [vmem:[%s6444_s8 + $0x318] ss:$28 sps:$4 sm:$0xff]   ;;  %v4750_v50 = vld [vmem:[%s6444_s8 + $0x2e0] ss:$28 sps:$4 sm:$0xff]  }
 0x3b0   :  { %v2148_v58 = vpop.f32.mrf.mxu0  ;;  %v2189_v59 = vpop.f32.mrf.mxu1  ;;  %v4747_v47 = vld [vmem:[%s6444_s8 + $0x198] ss:$28 sps:$4 sm:$0xff]   ;;  %v4753_v61 = vld [vmem:[%s6444_s8 + $0x160] ss:$28 sps:$4 sm:$0xff]   ;;  %v4758_v51 = vld [vmem:[%s6444_s8 + $0x2ac] ss:$28 sps:$4 sm:$0xff]  }
 0x3b1   :  { %v2193_v60 = vmax.f32 %v2147_v54, 0.0  ;;  %v2195_v0 = vmax.f32 %v2188_v55, 0.0  ;;  %v6015_v10 = vpack.c.bf16 %v2192_v56, %v2192_v56  ;;  %v6017_v11 = vpack.c.bf16 %v2194_v57, %v2194_v57  ;;  %v4761_v53 = vld [vmem:[%s6444_s8 + $0x12c] ss:$28 sps:$4 sm:$0xff]   ;;  %v4764_v56 = vld [vmem:[%s6444_s8 + $0x274] ss:$28 sps:$4 sm:$0xff]  }
 0x3b2   :  { %v2149_v2 = vpop.f32.mrf.mxu0  ;;  %v2190_v3 = vpop.f32.mrf.mxu1  ;;  %v4756_v54 = vld [vmem:[%s6444_s8 + $0x2a8] ss:$28 sps:$4 sm:$0xff]   ;;  %v4767_v57 = vld [vmem:[%s6444_s8 + $0xf4] ss:$28 sps:$4 sm:$0xff]  }
 0x3b3   :  { %v6005_v4 = vpack.c.bf16 %v2193_v60, %v2193_v60  ;;  %v6007_v5 = vpack.c.bf16 %v2195_v0, %v2195_v0  ;;  %v4759_v55 = vld [vmem:[%s6444_s8 + $0x128] ss:$28 sps:$4 sm:$0xff]   ;;  %v4762_v58 = vld [vmem:[%s6444_s8 + $0x270] ss:$28 sps:$4 sm:$0xff]   ;;  %v4770_v60 = vld [vmem:[%s6444_s8 + $0x23c] ss:$28 sps:$4 sm:$0xff]  }
 0x3b4   :  { %v4765_v59 = vld [vmem:[%s6444_s8 + $0xf0] ss:$28 sps:$4 sm:$0xff]   ;;  %v4773_v0 = vld [vmem:[%s6444_s8 + $0xbc] ss:$28 sps:$4 sm:$0xff]  }
 0x3b5   :  { %3372 = vmatprep.mubr.bf16.mxu0 %v6005_v4  ;;  %4188 = vmatprep.mubr.msk.bf16.mxu1 %vm1252_vm0, %v6007_v5  ;;  %v4768_v2 = vld [vmem:[%s6444_s8 + $0x238] ss:$28 sps:$4 sm:$0xff]  }
 0x3b6   :  { %3373 = vmatmul.mubr.bf16.vlgmr.msra.gmra.mxu0 %v6015_v10  ;;  %3414 = vmatmul.mubr.bf16.vlgmr.msra.gmra.mxu1 %v6017_v11  ;;  %v4771_v3 = vld [vmem:[%s6444_s8 + $0xb8] ss:$28 sps:$4 sm:$0xff]  }
 0x3b7   :  { %3423 = vmatpush1.bf16.msra.mxu1 %v4690_v6  ;;  %3464 = vmatpush1.bf16.msra.mxu0 %v4693_v7  ;;  %v4776_v6 = vld [vmem:[%s6444_s8 + $0x204] ss:$28 sps:$4 sm:$0xff]  }
 0x3b8   :  { %3454 = vmatprep.mubr.bf16.mxu1 %v6005_v4  ;;  %4189 = vmatprep.mubr.msk.bf16.mxu0 %vm1252_vm0, %v6007_v5  ;;  %v4779_v7 = vld [vmem:[%s6444_s8 + $0x84] ss:$28 sps:$4 sm:$0xff]  }
 0x3b9   :  { %3424 = vmatprep.subr.bf16.mxu1 %v4698_v12  ;;  %3465 = vmatprep.subr.bf16.mxu0 %v4701_v13  ;;  %v4774_v12 = vld [vmem:[%s6444_s8 + $0x200] ss:$28 sps:$4 sm:$0xff]  }
 0x3ba   :  { %v4777_v13 = vld [vmem:[%s6444_s8 + $0x80] ss:$28 sps:$4 sm:$0xff]  }
 0x3bb   :  { %3425 = vmatpush1.bf16.msra.mxu1 %v4696_v14  ;;  %3466 = vmatpush1.bf16.msra.mxu0 %v4699_v15  ;;  %v4782_v14 = vld [vmem:[%s6444_s8 + $0x1cc] ss:$28 sps:$4 sm:$0xff]  }
 0x3bc   :  { %3426 = vmatprep.subr.bf16.mxu1 %v4704_v17  ;;  %3467 = vmatprep.subr.bf16.mxu0 %v4707_v18  ;;  %v4785_v15 = vld [vmem:[%s6444_s8 + $0x4c] ss:$28 sps:$4 sm:$0xff]  }
 0x3bd   :  { %v4780_v17 = vld [vmem:[%s6444_s8 + $0x1c8] ss:$28 sps:$4 sm:$0xff]  }
 0x3be   :  { %v4783_v18 = vld [vmem:[%s6444_s8 + $0x48] ss:$28 sps:$4 sm:$0xff]  }
 0x3bf   :  { %3427 = vmatpush1.bf16.msra.mxu1 %v4702_v21  ;;  %3468 = vmatpush1.bf16.msra.mxu0 %v4705_v22  ;;  %v4788_v21 = vld [vmem:[%s6444_s8 + $0x14] ss:$28 sps:$4 sm:$0xff]   ;;  %v4791_v22 = vld [vmem:[%s6444_s8 + $0x51c] ss:$28 sps:$4 sm:$0xff]  }
 0x3c0   :  { %3428 = vmatprep.subr.bf16.mxu1 %v4710_v23  ;;  %3469 = vmatprep.subr.bf16.mxu0 %v4713_v24  ;;  %v4786_v23 = vld [vmem:[%s6444_s8 + $0x10] ss:$28 sps:$4 sm:$0xff]   ;;  %v4789_v24 = vld [vmem:[%s6444_s8 + $0x518] ss:$28 sps:$4 sm:$0xff]  }
 0x3c3   :  { %3429 = vmatpush1.bf16.msra.mxu1 %v4708_v25  ;;  %3470 = vmatpush1.bf16.msra.mxu0 %v4711_v26  ;;  %v4794_v25 = vld [vmem:[%s6444_s8 + $0x35c] ss:$28 sps:$4 sm:$0xff]   ;;  %v4797_v26 = vld [vmem:[%s6444_s8 + $0x4e4] ss:$28 sps:$4 sm:$0xff]  }
 0x3c4   :  { %3430 = vmatprep.subr.bf16.mxu1 %v4716_v27  ;;  %3471 = vmatprep.subr.bf16.mxu0 %v4719_v28  ;;  %v4792_v27 = vld [vmem:[%s6444_s8 + $0x358] ss:$28 sps:$4 sm:$0xff]   ;;  %v4795_v28 = vld [vmem:[%s6444_s8 + $0x4e0] ss:$28 sps:$4 sm:$0xff]  }
 0x3c7   :  { %3431 = vmatpush1.bf16.msra.mxu1 %v4714_v29  ;;  %3472 = vmatpush1.bf16.msra.mxu0 %v4717_v30  ;;  %v4800_v29 = vld [vmem:[%s6444_s8 + $0x324] ss:$28 sps:$4 sm:$0xff]   ;;  %v4803_v30 = vld [vmem:[%s6444_s8 + $0x4ac] ss:$28 sps:$4 sm:$0xff]  }
 0x3c8   :  { %3432 = vmatprep.subr.bf16.mxu1 %v4722_v32  ;;  %3473 = vmatprep.subr.bf16.mxu0 %v4725_v52  ;;  %v4798_v32 = vld [vmem:[%s6444_s8 + $0x320] ss:$28 sps:$4 sm:$0xff]   ;;  %v4801_v52 = vld [vmem:[%s6444_s8 + $0x4a8] ss:$28 sps:$4 sm:$0xff]  }
 0x3cb   :  { %3433 = vmatpush1.bf16.msra.mxu1 %v4720_v33  ;;  %3474 = vmatpush1.bf16.msra.mxu0 %v4723_v34  ;;  %v4806_v33 = vld [vmem:[%s6444_s8 + $0x2ec] ss:$28 sps:$4 sm:$0xff]   ;;  %v4809_v34 = vld [vmem:[%s6444_s8 + $0x474] ss:$28 sps:$4 sm:$0xff]  }
 0x3cc   :  { %3434 = vmatprep.subr.bf16.mxu1 %v4728_v20  ;;  %3475 = vmatprep.subr.bf16.mxu0 %v4731_v35  ;;  %v4804_v20 = vld [vmem:[%s6444_s8 + $0x2e8] ss:$28 sps:$4 sm:$0xff]   ;;  %v4807_v35 = vld [vmem:[%s6444_s8 + $0x470] ss:$28 sps:$4 sm:$0xff]  }
 0x3cf   :  { %3435 = vmatpush1.bf16.msra.mxu1 %v4726_v8  ;;  %3476 = vmatpush1.bf16.msra.mxu0 %v4729_v37  ;;  %v4812_v8 = vld [vmem:[%s6444_s8 + $0x2b4] ss:$28 sps:$4 sm:$0xff]   ;;  %v4815_v37 = vld [vmem:[%s6444_s8 + $0x43c] ss:$28 sps:$4 sm:$0xff]  }
 0x3d0   :  { %3436 = vmatprep.subr.bf16.mxu1 %v4734_v38  ;;  %3477 = vmatprep.subr.bf16.mxu0 %v4737_v39  ;;  %v4810_v38 = vld [vmem:[%s6444_s8 + $0x2b0] ss:$28 sps:$4 sm:$0xff]   ;;  %v4813_v39 = vld [vmem:[%s6444_s8 + $0x438] ss:$28 sps:$4 sm:$0xff]  }
 0x3d3   :  { %3437 = vmatpush1.bf16.msra.mxu1 %v4732_v36  ;;  %3478 = vmatpush1.bf16.msra.mxu0 %v4735_v19  ;;  %v4818_v36 = vld [vmem:[%s6444_s8 + $0x27c] ss:$28 sps:$4 sm:$0xff]   ;;  %v4821_v19 = vld [vmem:[%s6444_s8 + $0x404] ss:$28 sps:$4 sm:$0xff]  }
 0x3d4   :  { %3438 = vmatprep.subr.bf16.mxu1 %v4740_v40  ;;  %3493 = vmatprep.subr.bf16.mxu0 %v4743_v41  ;;  %v4816_v40 = vld [vmem:[%s6444_s8 + $0x278] ss:$28 sps:$4 sm:$0xff]   ;;  %v4819_v41 = vld [vmem:[%s6444_s8 + $0x400] ss:$28 sps:$4 sm:$0xff]  }
 0x3d7   :  { %3439 = vmatpush2.bf16.msra.mxu1 %v4738_v42  ;;  %3494 = vmatpush2.bf16.msra.mxu0 %v4741_v43  ;;  %v4824_v42 = vld [vmem:[%s6444_s8 + $0x244] ss:$28 sps:$4 sm:$0xff]   ;;  %v4827_v43 = vld [vmem:[%s6444_s8 + $0x3cc] ss:$28 sps:$4 sm:$0xff]  }
 0x3d8   :  { %3440 = vmatprep.subr.bf16.mxu1 %v4746_v44  ;;  %3504 = vmatprep.subr.bf16.mxu0 %v4749_v45  ;;  %v4822_v44 = vld [vmem:[%s6444_s8 + $0x240] ss:$28 sps:$4 sm:$0xff]   ;;  %v4825_v45 = vld [vmem:[%s6444_s8 + $0x3c8] ss:$28 sps:$4 sm:$0xff]  }
 0x3da   :  { %3496 = vmatmul.mubr.bf16.vlgmr.msra.gmra.mxu0 %v6017_v11 }
 0x3db   :  { %3441 = vmatpush2.bf16.msra.mxu1 %v4744_v46  ;;  %3505 = vmatpush1.bf16.msra.mxu0 %v4747_v47  ;;  %v4830_v46 = vld [vmem:[%s6444_s8 + $0x20c] ss:$28 sps:$4 sm:$0xff]   ;;  %v4833_v47 = vld [vmem:[%s6444_s8 + $0x394] ss:$28 sps:$4 sm:$0xff]  }
 0x3dc   :  { %3536 = vmatprep.mubr.bf16.mxu0 %v6005_v4  ;;  %3442 = vmatprep.subr.bf16.mxu1 %v4752_v48  ;;  %v4828_v48 = vld [vmem:[%s6444_s8 + $0x208] ss:$28 sps:$4 sm:$0xff]  }
 0x3dd   :  { %3506 = vmatprep.subr.bf16.mxu0 %v4755_v49  ;;  %v4831_v49 = vld [vmem:[%s6444_s8 + $0x390] ss:$28 sps:$4 sm:$0xff]  }
 0x3df   :  { %3443 = vmatpush2.bf16.msra.mxu1 %v4750_v50  ;;  %3507 = vmatpush1.bf16.msra.mxu0 %v4753_v61  ;;  %v4836_v50 = vld [vmem:[%s6444_s8 + $0x1d4] ss:$28 sps:$4 sm:$0xff]  }
 0x3e0   :  { %3444 = vmatprep.subr.bf16.mxu1 %v4758_v51  ;;  %3508 = vmatprep.subr.bf16.mxu0 %v4761_v53  ;;  %v4839_v61 = vld [vmem:[%s6444_s8 + $0x554] ss:$28 sps:$4 sm:$0xff]  }
 0x3e1   :  { %v4834_v51 = vld [vmem:[%s6444_s8 + $0x1d0] ss:$28 sps:$4 sm:$0xff]  }
 0x3e2   :  { %v4837_v53 = vld [vmem:[%s6444_s8 + $0x550] ss:$28 sps:$4 sm:$0xff]  }
 0x3e3   :  { %3445 = vmatpush2.bf16.msra.mxu1 %v4756_v54  ;;  %3509 = vmatpush1.bf16.msra.mxu0 %v4759_v55  ;;  %v4840_v54 = vld [vmem:[%s6444_s8 + $0x360] ss:$28 sps:$4 sm:$0xff]  }
 0x3e4   :  { %3446 = vmatprep.subr.bf16.mxu1 %v4764_v56  ;;  %3510 = vmatprep.subr.bf16.mxu0 %v4767_v57  ;;  %v4841_v55 = vld [vmem:[%s6444_s8 + $0x1a0] ss:$28 sps:$4 sm:$0xff]   ;;  %v4843_v57 = vld [vmem:[%s6444_s8 + $0x328] ss:$28 sps:$4 sm:$0xff]  }
 0x3e5   :  { %v4842_v56 = vld [vmem:[%s6444_s8 + $0x520] ss:$28 sps:$4 sm:$0xff]  }
 0x3e7   :  { %3447 = vmatpush2.bf16.msra.mxu1 %v4762_v58  ;;  %3511 = vmatpush1.bf16.msra.mxu0 %v4765_v59  ;;  %v4844_v58 = vld [vmem:[%s6444_s8 + $0x168] ss:$28 sps:$4 sm:$0xff]  }
 0x3e8   :  { %3448 = vmatprep.subr.bf16.mxu1 %v4770_v60  ;;  %3512 = vmatprep.subr.bf16.mxu0 %v4773_v0  ;;  %v4845_v59 = vld [vmem:[%s6444_s8 + $0x4e8] ss:$28 sps:$4 sm:$0xff]   ;;  %v4846_v60 = vld [vmem:[%s6444_s8 + $0x2f0] ss:$28 sps:$4 sm:$0xff]   ;;  %v4849_v0 = vld [vmem:[%s6444_s8 + $0x2b8] ss:$28 sps:$4 sm:$0xff]  }
 0x3eb   :  { %3449 = vmatpush2.bf16.msra.mxu1 %v4768_v2  ;;  %3513 = vmatpush1.bf16.msra.mxu0 %v4771_v3  ;;  %v4850_v2 = vld [vmem:[%s6444_s8 + $0xf8] ss:$28 sps:$4 sm:$0xff]  }
 0x3ec   :  { %3450 = vmatprep.subr.bf16.mxu1 %v4776_v6  ;;  %3514 = vmatprep.subr.bf16.mxu0 %v4779_v7  ;;  %v4851_v3 = vld [vmem:[%s6444_s8 + $0x478] ss:$28 sps:$4 sm:$0xff]   ;;  %v4852_v6 = vld [vmem:[%s6444_s8 + $0x280] ss:$28 sps:$4 sm:$0xff]  }
 0x3ed   :  { %v4853_v7 = vld [vmem:[%s6444_s8 + $0xc0] ss:$28 sps:$4 sm:$0xff]  }
 0x3ef   :  { %3451 = vmatpush2.bf16.msra.mxu1 %v4774_v12  ;;  %3515 = vmatpush1.bf16.msra.mxu0 %v4777_v13  ;;  %v4854_v12 = vld [vmem:[%s6444_s8 + $0x440] ss:$28 sps:$4 sm:$0xff]   ;;  %v4855_v13 = vld [vmem:[%s6444_s8 + $0x248] ss:$28 sps:$4 sm:$0xff]  }
 0x3f0   :  { %3452 = vmatprep.subr.bf16.mxu1 %v4782_v14  ;;  %3516 = vmatprep.subr.bf16.mxu0 %v4785_v15  ;;  %v4856_v14 = vld [vmem:[%s6444_s8 + $0x88] ss:$28 sps:$4 sm:$0xff]  }
 0x3f1   :  { %v4857_v15 = vld [vmem:[%s6444_s8 + $0x408] ss:$28 sps:$4 sm:$0xff]  }
 0x3f3   :  { %3453 = vmatpush2.bf16.msra.mxu1 %v4780_v17  ;;  %3517 = vmatpush1.bf16.msra.mxu0 %v4783_v18  ;;  %v4858_v17 = vld [vmem:[%s6444_s8 + $0x210] ss:$28 sps:$4 sm:$0xff]  }
 0x3f4   :  { %3518 = vmatprep.subr.bf16.mxu0 %v4788_v21  ;;  %3545 = vmatprep.subr.bf16.mxu1 %v4791_v22  ;;  %v4859_v18 = vld [vmem:[%s6444_s8 + $0x50] ss:$28 sps:$4 sm:$0xff]   ;;  %v4861_v22 = vld [vmem:[%s6444_s8 + $0x1d8] ss:$28 sps:$4 sm:$0xff]  }
 0x3f5   :  { %v4860_v21 = vld [vmem:[%s6444_s8 + $0x3d0] ss:$28 sps:$4 sm:$0xff]  }
 0x3f6   :  { %3455 = vmatmul.mubr.bf16.vlgmr.msra.gmra.mxu1 %v6015_v10 }
 0x3f7   :  { %3519 = vmatpush1.bf16.msra.mxu0 %v4786_v23  ;;  %3546 = vmatpush1.bf16.msra.mxu1 %v4789_v24  ;;  %v4862_v23 = vld [vmem:[%s6444_s8 + $0x18] ss:$28 sps:$4 sm:$0xff]  }
 0x3f8   :  { %4190 = vmatprep.mubr.msk.bf16.mxu1 %vm1252_vm0, %v6007_v5  ;;  %3520 = vmatprep.subr.bf16.mxu0 %v4794_v25  ;;  %v4863_v24 = vld [vmem:[%s6444_s8 + $0x398] ss:$28 sps:$4 sm:$0xff]  }
 0x3f9   :  { %3547 = vmatprep.subr.bf16.mxu1 %v4797_v26  ;;  %v4864_v25 = vld [vmem:[%s6444_s8 + $0x558] ss:$28 sps:$4 sm:$0xff]   ;;  %v6414_v26 = vld [vmem:[%s6445_s9] sm:$0x7f] }
 0x3fb   :  { %3521 = vmatpush2.bf16.msra.mxu0 %v4792_v27  ;;  %3548 = vmatpush1.bf16.msra.mxu1 %v4795_v28  ;;  %v2405_v27 = vrot.slane %v6414_v26, %v5718_v63  ;;  %v2409_v28 = vrot.slane %v6414_v26, %v5724_v1 }
 0x3fc   :  { %3522 = vmatprep.subr.bf16.mxu0 %v4800_v29  ;;  %3549 = vmatprep.subr.bf16.mxu1 %v4803_v30 }
 0x3ff   :  { %3523 = vmatpush2.bf16.msra.mxu0 %v4798_v32  ;;  %3550 = vmatpush1.bf16.msra.mxu1 %v4801_v52 }
 0x400   :  { %3524 = vmatprep.subr.bf16.mxu0 %v4806_v33  ;;  %3551 = vmatprep.subr.bf16.mxu1 %v4809_v34 }
 0x403   :  { %3525 = vmatpush2.bf16.msra.mxu0 %v4804_v20  ;;  %3552 = vmatpush1.bf16.msra.mxu1 %v4807_v35 }
 0x404   :  { %3526 = vmatprep.subr.bf16.mxu0 %v4812_v8  ;;  %3553 = vmatprep.subr.bf16.mxu1 %v4815_v37 }
 0x407   :  { %3527 = vmatpush2.bf16.msra.mxu0 %v4810_v38  ;;  %3554 = vmatpush1.bf16.msra.mxu1 %v4813_v39 }
 0x408   :  { %3528 = vmatprep.subr.bf16.mxu0 %v4818_v36  ;;  %3555 = vmatprep.subr.bf16.mxu1 %v4821_v19 }
 0x40b   :  { %3529 = vmatpush2.bf16.msra.mxu0 %v4816_v40  ;;  %3556 = vmatpush1.bf16.msra.mxu1 %v4819_v41 }
 0x40c   :  { %3530 = vmatprep.subr.bf16.mxu0 %v4824_v42  ;;  %3557 = vmatprep.subr.bf16.mxu1 %v4827_v43 }
 0x40f   :  { %3531 = vmatpush2.bf16.msra.mxu0 %v4822_v44  ;;  %3558 = vmatpush1.bf16.msra.mxu1 %v4825_v45 }
 0x410   :  { %3532 = vmatprep.subr.bf16.mxu0 %v4830_v46  ;;  %3559 = vmatprep.subr.bf16.mxu1 %v4833_v47 }
 0x413   :  { %3533 = vmatpush2.bf16.msra.mxu0 %v4828_v48  ;;  %3560 = vmatpush1.bf16.msra.mxu1 %v4831_v49 }
 0x414   :  { %3534 = vmatprep.subr.bf16.mxu0 %v4836_v50  ;;  %3575 = vmatprep.subr.bf16.mxu1 %v4839_v61 }
 0x417   :  { %3535 = vmatpush2.bf16.msra.mxu0 %v4834_v51  ;;  %3576 = vmatpush2.bf16.msra.mxu1 %v4837_v53 }
 0x418   :  { %4222 = vmatprep.subr.bf16.mxu1 %v4840_v54  ;;  %3626 = vmatprep.subr.bf16.mxu0 %v4925_v16 }
 0x41a   :  { %3537 = vmatmul.mubr.bf16.vlgmr.msra.gmra.mxu0 %v6015_v10  ;;  %3578 = vmatmul.mubr.bf16.vlgmr.msra.gmra.mxu1 %v6017_v11 }
 0x41b   :  { %4223 = vmatpush3.bf16.msra.mxu1 %v4841_v55  ;;  %3618 = vmatprep.mubr.bf16.mxu1 %v6005_v4  ;;  %v4847_v4 = vld [vmem:[%s6444_s8 + $0x130] ss:$28 sps:$4 sm:$0xff]  }
 0x41c   :  { %3627 = vmatpush1.bf16.msra.mxu0 %v4842_v56  ;;  %4191 = vmatprep.mubr.msk.bf16.mxu0 %vm1252_vm0, %v6007_v5  ;;  %v4848_v5 = vld [vmem:[%s6444_s8 + $0x4b0] ss:$28 sps:$4 sm:$0xff]   ;;  %s4927_s8 = smov [#allocation4]  }
 0x41d   :  { %4224 = vmatprep.subr.bf16.mxu1 %v4843_v57  ;;  %3628 = vmatprep.subr.bf16.mxu0 %v4925_v16  ;;  %s3744_s9 = sshll.u32 %s4927_s8, 4  ;;  %s3745_s9 = int_to_ptr.vmem [resolvable:$true] %s3744_s9 }
 0x41e   :  { %s4881_s27 = scalar_lea.vmem %s3745_s9, 128  ;;  %p4886_p1 = scmp.lt.s32.totalorder %s3745_s9, %s3745_s9 }
 0x41f   :  { %4225 = vmatpush3.bf16.msra.mxu1 %v4844_v58  ;;  %p4882_p0 = scmp.ne.s32.totalorder %s3745_s9, %s4881_s27  ;;  %p4887_p2 = scmp.lt.s32.totalorder %s4881_s27, %s4881_s27 }
 0x420   :  { %3629 = vmatpush1.bf16.msra.mxu0 %v4845_v59  ;;  %4226 = vmatprep.subr.bf16.mxu1 %v4846_v60 }
 0x421   :  { %3630 = vmatprep.subr.bf16.mxu0 %v4925_v16  ;;  %p4888_p3 = por %p4887_p2, %p4886_p1 }
 0x423   :  { %4227 = vmatpush3.bf16.msra.mxu1 %v4847_v4  ;;  %p4889_p4 = pnand %p4888_p3, %p4882_p0 }
 0x424   :  { %3631 = vmatpush1.bf16.msra.mxu0 %v4848_v5  ;;  %4228 = vmatprep.subr.bf16.mxu1 %v4849_v0 }
 0x425   :  { %3632 = vmatprep.subr.bf16.mxu0 %v4925_v16 }
 0x427   :  { %4229 = vmatpush3.bf16.msra.mxu1 %v4850_v2 }
 0x428   :  { %3633 = vmatpush1.bf16.msra.mxu0 %v4851_v3  ;;  %4230 = vmatprep.subr.bf16.mxu1 %v4852_v6 }
 0x429   :  { %3634 = vmatprep.subr.bf16.mxu0 %v4925_v16 }
 0x42b   :  { %4231 = vmatpush3.bf16.msra.mxu1 %v4853_v7 }
 0x42c   :  { %3635 = vmatpush1.bf16.msra.mxu0 %v4854_v12  ;;  %4232 = vmatprep.subr.bf16.mxu1 %v4855_v13 }
 0x42d   :  { %3636 = vmatprep.subr.bf16.mxu0 %v4925_v16 }
 0x42f   :  { %4233 = vmatpush3.bf16.msra.mxu1 %v4856_v14 }
 0x430   :  { %3637 = vmatpush1.bf16.msra.mxu0 %v4857_v15  ;;  %4234 = vmatprep.subr.bf16.mxu1 %v4858_v17 }
 0x431   :  { %3638 = vmatprep.subr.bf16.mxu0 %v4925_v16 }
 0x433   :  { %4235 = vmatpush3.bf16.msra.mxu1 %v4859_v18 }
 0x434   :  { %3639 = vmatpush1.bf16.msra.mxu0 %v4860_v21  ;;  %4236 = vmatprep.subr.bf16.mxu1 %v4861_v22 }
 0x435   :  { %3640 = vmatprep.subr.bf16.mxu0 %v4925_v16 }
 0x437   :  { %4237 = vmatpush3.bf16.msra.mxu1 %v4862_v23 }
 0x438   :  { %3641 = vmatpush1.bf16.msra.mxu0 %v4863_v24 }
 0x439   :  { %3656 = vmatprep.subr.bf16.mxu0 %v4925_v16 }
 0x43a   :  { %3619 = vmatmul.mubr.bf16.vlgmr.msra.gmra.mxu1 %v6015_v10 }
 0x43c   :  { %3657 = vmatpush2.bf16.msra.mxu0 %v4864_v25 }
 0x43f   :  { %3659 = vmatmul.mubr.bf16.vlgmr.msra.gmra.mxu0 %v6017_v11 }
 0x476   :  { %v3374_v29 = vpop.f32.mrf.mxu0  ;;  %v3415_v30 = vpop.f32.mrf.mxu1 }
 0x477   :  { %v3375_v32 = vadd.f32 %v3374_v29, %v2405_v27 }
 0x478   :  { %v3376_v16 = vpop.f32.mrf.mxu0  ;;  %v3417_v52 = vpop.f32.mrf.mxu1 }
 0x479   :  { %v3416_v10 = vadd.f32 %v3415_v30, %v3375_v32  ;;  %v3377_v33 = vadd.f32 %v3376_v16, %v2409_v28 }
 0x47a   :  { %v3378_v34 = vpop.f32.mrf.mxu0  ;;  %v3419_v11 = vpop.f32.mrf.mxu1 }
 0x47b   :  { %v3666_v20 = vmul.f32 0.5, %v3416_v10  ;;  %v3418_v35 = vadd.f32 %v3417_v52, %v3377_v33 }
 0x47c   :  { %v3379_v8 = vpop.f32.mrf.mxu0  ;;  %v3420_v37 = vpop.f32.mrf.mxu1 }
 0x47d   :  { %4867 = vtanh.f32 %v3666_v20  ;;  %v3667_v38 = vmul.f32 0.5, %v3418_v35 }
 0x47f   :  { %4869 = vtanh.f32 %v3667_v38 }
 0x48a   :  { %v4868_v63 = vpop.eup %4867 }
 0x48b   :  { %v3680_v39 = vmul.f32 0.5, %v4868_v63 }
 0x48c   :  { %v4870_v36 = vpop.eup %4869 }
 0x48d   :  { %v3681_v1 = vmul.f32 0.5, %v4870_v36  ;;  %v3687_v19 = vadd.f32 0.5, %v3680_v39 }
 0x48f   :  { %v3688_v40 = vadd.f32 0.5, %v3681_v1 }
 0x491   :  { %v4196_v41 = vpack.c.bf16 %v3688_v40, %v3687_v19 }
 0x493   :  { %3723 = vst [vmem:[#allocation2] sm:$0xff] %v4196_v41 }
 0x49a   :  { %v3497_v42 = vpop.f32.mrf.mxu0 }
 0x49b   :  { %4892 = shalt.err (!%p4889_p4)
}
 0x49c   :  { %3747 = dma.vmem_to_hbm [thread:$0]  %s3745_s9, 128, %s6447_s11, [#allocation5]   ;;  %v3499_v43 = vpop.f32.mrf.mxu0  ;;  %v2413_v46 = vrot.slane %v6414_v26, %v5730_v31  ;;  %v2417_v47 = vrot.slane %v6414_v26, %v5733_v9  ;;  %v2420_v9 = vsub.s32 4, %v5715_v62  ;;  %v2424_v2 = vsub.s32 5, %v5715_v62 }
 0x49d   :  { %v2428_v34 = vsub.s32 6, %v5715_v62  ;;  %s4928_s11 = smov [#allocation2]   ;;  %vm3726_vm2 = vcmask 125952  }
 0x49e   :  { %v3501_v44 = vpop.f32.mrf.mxu0  ;;  %v2421_v3 = vrot.slane %v6414_v26, %v2420_v9  ;;  %v2425_v6 = vrot.slane %v6414_v26, %v2424_v2  ;;  %s3734_s30 = sshll.u32 %s4928_s11, 4  ;;  %s3735_s30 = int_to_ptr.vmem [resolvable:$true] %s3734_s30 }
 0x49f   :  { %v2429_v20 = vrot.slane %v6414_v26, %v2428_v34  ;;  %s4901_s12 = scalar_lea.vmem %s3735_s30, 448  ;;  %p4906_p6 = scmp.lt.s32.totalorder %s3735_s30, %s3735_s30 }
 0x4a0   :  { %v3502_v45 = vpop.f32.mrf.mxu0  ;;  %p4902_p5 = scmp.ne.s32.totalorder %s3735_s30, %s4901_s12  ;;  %p4907_p7 = scmp.lt.s32.totalorder %s4901_s12, %s4901_s12 }
 0x4a2   :  { %p4908_p8 = por %p4907_p7, %p4906_p6 }
 0x4a4   :  { %p4909_p9 = pnand %p4908_p8, %p4902_p5 }
 0x4b6   :  { %v3456_v48 = vpop.f32.mrf.mxu1 }
 0x4b7   :  { %v3457_v49 = vadd.f32 %v3456_v48, %v2413_v46 }
 0x4b8   :  { %v3458_v50 = vpop.f32.mrf.mxu1 }
 0x4b9   :  { %v3498_v61 = vadd.f32 %v3497_v42, %v3457_v49  ;;  %v3459_v51 = vadd.f32 %v3458_v50, %v2417_v47 }
 0x4ba   :  { %v3460_v53 = vpop.f32.mrf.mxu1 }
 0x4bb   :  { %v3668_v54 = vmul.f32 0.5, %v3498_v61  ;;  %v3500_v55 = vadd.f32 %v3499_v43, %v3459_v51 }
 0x4bc   :  { %v3461_v56 = vpop.f32.mrf.mxu1 }
 0x4bd   :  { %4871 = vtanh.f32 %v3668_v54  ;;  %v3669_v57 = vmul.f32 0.5, %v3500_v55 }
 0x4bf   :  { %4873 = vtanh.f32 %v3669_v57 }
 0x4ca   :  { %v4872_v58 = vpop.eup %4871 }
 0x4cb   :  { %v3682_v59 = vmul.f32 0.5, %v4872_v58 }
 0x4cc   :  { %v4874_v60 = vpop.eup %4873 }
 0x4cd   :  { %v3683_v4 = vmul.f32 0.5, %v4874_v60  ;;  %v3689_v31 = vadd.f32 0.5, %v3682_v59 }
 0x4cf   :  { %v3690_v5 = vadd.f32 0.5, %v3683_v4 }
 0x4d1   :  { %v4197_v0 = vpack.c.bf16 %v3690_v5, %v3689_v31 }
 0x4d3   :  { %3724 = vst [vmem:[#allocation2 + $0x8] sm:$0xff] %v4197_v0 }
 0x4da   :  { %v3538_v7 = vpop.f32.mrf.mxu0  ;;  %v3579_v12 = vpop.f32.mrf.mxu1 }
 0x4db   :  { %v3539_v13 = vadd.f32 %v3538_v7, %v2421_v3 }
 0x4dc   :  { %v3540_v14 = vpop.f32.mrf.mxu0  ;;  %v3581_v15 = vpop.f32.mrf.mxu1 }
 0x4dd   :  { %v3580_v17 = vadd.f32 %v3579_v12, %v3539_v13  ;;  %v3541_v18 = vadd.f32 %v3540_v14, %v2425_v6 }
 0x4de   :  { %v3542_v21 = vpop.f32.mrf.mxu0  ;;  %v3583_v22 = vpop.f32.mrf.mxu1 }
 0x4df   :  { %v3670_v23 = vmul.f32 0.5, %v3580_v17  ;;  %v3582_v24 = vadd.f32 %v3581_v15, %v3541_v18 }
 0x4e0   :  { %v3543_v25 = vpop.f32.mrf.mxu0  ;;  %v3584_v27 = vpop.f32.mrf.mxu1 }
 0x4e1   :  { %4875 = vtanh.f32 %v3670_v23  ;;  %v3671_v28 = vmul.f32 0.5, %v3582_v24 }
 0x4e3   :  { %4877 = vtanh.f32 %v3671_v28 }
 0x4ee   :  { %v4876_v29 = vpop.eup %4875 }
 0x4ef   :  { %v3684_v30 = vmul.f32 0.5, %v4876_v29 }
 0x4f0   :  { %v4878_v32 = vpop.eup %4877 }
 0x4f1   :  { %v3685_v16 = vmul.f32 0.5, %v4878_v32  ;;  %v3691_v52 = vadd.f32 0.5, %v3684_v30 }
 0x4f3   :  { %v3692_v10 = vadd.f32 0.5, %v3685_v16 }
 0x4f5   :  { %v4198_v33 = vpack.c.bf16 %v3692_v10, %v3691_v52 }
 0x4f7   :  { %3725 = vst [vmem:[#allocation2 + $0x10] sm:$0xff] %v4198_v33 }
 0x4fa   :  { %v4238_v11 = vpop.f32.mrf.mxu1 }
 0x4fc   :  { %v4239_v35 = vpop.f32.mrf.mxu1 }
 0x4fd   :  { %v4240_v8 = vadd.f32 %v4239_v35, %v4238_v11 }
 0x4fe   :  { %v4241_v37 = vpop.f32.mrf.mxu1 }
 0x4ff   :  { %v3621_v38 = vadd.f32 %v4240_v8, %v2429_v20  ;;  %v3660_v63 = vpop.f32.mrf.mxu0 }
 0x500   :  { %v4242_v39 = vpop.f32.mrf.mxu1 }
 0x501   :  { %v3661_v36 = vadd.f32 %v3660_v63, %v3621_v38  ;;  %v3662_v1 = vpop.f32.mrf.mxu0 }
 0x503   :  { %v3672_v19 = vmul.f32 0.5, %v3661_v36  ;;  %v3663_v40 = vpop.f32.mrf.mxu0 }
 0x505   :  { %4879 = vtanh.f32 %v3672_v19  ;;  %v3664_v41 = vpop.f32.mrf.mxu0 }
 0x512   :  { %v4880_v42 = vpop.eup %4879 }
 0x513   :  { %v3686_v43 = vmul.f32 0.5, %v4880_v42 }
 0x515   :  { %v3693_v62 = vadd.f32 0.5, %v3686_v43 }
 0x517   :  { %v4199_v44 = vpack.c.bf16 %v3693_v62, %v3693_v62 }
 0x519   :  { %3727 = vst.msk [vmem:[#allocation2 + $0x18] sm:$0xf] %vm3726_vm2, %v4199_v44 }
 0x51a   :  { %4912 = shalt.err (!%p4909_p9)
}
 0x51b   :  { %3737 = dma.vmem_to_hbm [thread:$0]  %s3735_s30, 448, %s6446_s10, [#allocation3]  }
 0x51c   :  { %4921 = dma.done.wait [#allocation3], 448  }
 0x51d   :  { %4922 = vsyncadd [#allocation3], 4294966848 }
 0x51e   :  { %4923 = dma.done.wait [#allocation5], 128  }
 0x51f   :  { %4924 = vsyncadd [#allocation5], 4294967168 }
 0x520   :  { %3754 = vsyncpa [#allocation3], 1 }
 0x521   :  { %3755 = vsyncpa [#allocation5], 1 }

</bundles_post_ra>
